<compile_context>
chip_gen: v5e
topology: v5e:2x2
jax: 0.10.0
libtpu: 0.0.40
codegen_flags: <defaults>
</compile_context>

<pallas_src>
import functools
import math

import jax
import jax.numpy as jnp
from jax.experimental import pallas as pl
from jax.experimental.pallas import tpu as pltpu


def _sincos_poly(t):
    """sin/cos via range reduction + trimmed f32 Taylor (|err| <~ 2e-3).

    Fallback path built only from mul/add/floor (guaranteed Mosaic lowerings).
    """
    two_pi = 2.0 * math.pi
    n = jnp.floor(t * (1.0 / two_pi) + 0.5)
    y = t - n * two_pi                       # y in [-pi, pi]
    y2 = y * y
    # 5 correction terms each (trimmed from 7 -- plenty for the tolerance).
    sin_c = (-1.0 / 6, 1.0 / 120, -1.0 / 5040, 1.0 / 362880, -1.0 / 39916800)
    cos_c = (-1.0 / 2, 1.0 / 24, -1.0 / 720, 1.0 / 40320, -1.0 / 3628800)
    p = sin_c[-1]
    for c in reversed(sin_c[:-1]):
        p = p * y2 + c
    q = cos_c[-1]
    for c in reversed(cos_c[:-1]):
        q = q * y2 + c
    return y + y * y2 * p, 1.0 + y2 * q


def _fourier_pe_kernel(use_native_sincos, x_ref, w_ref, o_ref):
    """One (batch, row-tile) step: o[0] = cos(x @ W), o[1] = sin(x @ W)."""
    x = x_ref[0].astype(jnp.float32)   # (block_rows, fold*M) -- upcast in VMEM
    w = w_ref[...]                     # (fold*M, fold*F_dim) f32, block-diag dup'd
    k_dim = w.shape[0]

    if k_dim >= 16:
        proj = jnp.dot(x, w, preferred_element_type=jnp.float32)
    else:
        # K is tiny (4 for LightGlue keypoints after folding): a few VPU
        # broadcast mul-adds beat a heavily padded narrow-K MXU matmul.
        proj = x[:, 0:1] * w[0:1, :]
        for m in range(1, k_dim):
            proj = proj + x[:, m:m + 1] * w[m:m + 1, :]

    if use_native_sincos:
        sin_p, cos_p = jnp.sin(proj), jnp.cos(proj)   # EUP transcendentals
    else:
        sin_p, cos_p = _sincos_poly(proj)             # VPU-only fallback

    o_ref[0, 0] = cos_p.astype(o_ref.dtype)
    o_ref[1, 0] = sin_p.astype(o_ref.dtype)


def _pick_fold(n, f_dim):
    """Token-fold factor so the output lane width becomes a multiple of 128."""
    if f_dim % 128 == 0:
        return 1
    fold = 128 // math.gcd(f_dim, 128)
    if fold <= 8 and n % fold == 0:
        return fold
    if f_dim < 128 and n % 2 == 0:
        return 2
    return 1


def _pick_block_rows(rows, width, out_itemsize, in_cols, in_itemsize, batch,
                     vmem_budget=10 * 1024 * 1024, max_rows=512):
    """Largest multiple-of-8 divisor of `rows` under a VMEM budget, >=2 steps."""
    bytes_per_row = (2 * width * out_itemsize + in_cols * in_itemsize) * 2  # x2 dbl-buf
    cap = max(8, vmem_budget // max(1, bytes_per_row))
    target = int(min(rows, max_rows, cap))

    def largest_div_mult8(limit):
        limit -= limit % 8
        for cand in range(limit, 7, -8):
            if rows % cand == 0:
                return cand
        return None

    best = largest_div_mult8(target)
    if best is None:
        return rows            # full-extent block (rows has no mult-of-8 divisor)
    # Guarantee >=2 grid steps when possible (feeds both v7x TCs, enables
    # DMA/compute overlap) without dropping below useful tile sizes.
    if batch * (rows // best) < 2:
        smaller = largest_div_mult8(best // 2)
        if smaller is not None:
            best = smaller
    return best


def learnable_fourier_pe(x, wr, *, out_dtype=None, block_rows=None,
                         use_native_sincos=True):
    """x: (B, N, M) positions; wr: (F_dim//2, M) = Wr.weight (no bias).

    Returns the module output (2, B, 1, N, F_dim): [cos; sin] planes with each
    projected value duplicated pairwise along the last dim.
    """
    B, N, M = x.shape
    f_half, m_w = wr.shape
    assert m_w == M, (wr.shape, x.shape)
    f_dim = 2 * f_half

    # Force a floating output dtype (integer pixel coords must not truncate).
    if out_dtype is None:
        out_dtype = x.dtype if jnp.issubdtype(x.dtype, jnp.floating) else jnp.float32
    out_dtype = jnp.dtype(out_dtype)
    assert jnp.issubdtype(out_dtype, jnp.floating), out_dtype

    # Fold `fold` tokens into the lane axis so stores are 128-lane dense.
    fold = _pick_fold(N, f_dim)
    rows = N // fold
    width = fold * f_dim
    in_cols = fold * M

    # Fold repeat_interleave(2, -1) into the weight (pairwise column dup), then
    # make it block-diagonal so the token-folded layout projects correctly.
    # In a production module this is precomputed once at init, not per forward.
    w_dup = jnp.repeat(wr.astype(jnp.float32).T, 2, axis=1)          # (M, F_dim)
    if fold == 1:
        w_bd = w_dup
    else:
        w_bd = jnp.kron(jnp.eye(fold, dtype=jnp.float32), w_dup)     # (fold*M, width)

    x_fold = x.reshape(B, rows, in_cols)   # metadata-only (row-major fold)

    if block_rows is None:
        block_rows = _pick_block_rows(rows, width, out_dtype.itemsize,
                                      in_cols, x.dtype.itemsize, B)
    if block_rows != rows:
        assert rows % block_rows == 0 and block_rows % 8 == 0, (rows, block_rows)
    grid = (B, rows // block_rows)

    cost = pl.CostEstimate(
        flops=2 * B * N * M * f_dim,
        transcendentals=2 * B * N * f_dim,
        bytes_accessed=B * N * M * x.dtype.itemsize
        + in_cols * width * 4
        + 2 * B * N * f_dim * out_dtype.itemsize,
    )

    kernel = functools.partial(_fourier_pe_kernel, use_native_sincos)
    out = pl.pallas_call(
        kernel,
        out_shape=jax.ShapeDtypeStruct((2, B, rows, width), out_dtype),
        grid=grid,
        in_specs=[
            pl.BlockSpec((1, block_rows, in_cols), lambda b, n: (b, n, 0)),  # positions
            pl.BlockSpec((in_cols, width), lambda b, n: (0, 0)),             # folded Wr
        ],
        out_specs=pl.BlockSpec((2, 1, block_rows, width), lambda b, n: (0, b, n, 0)),
        compiler_params=pltpu.CompilerParams(
            dimension_semantics=("parallel", "parallel")),
        cost_estimate=cost,
    )(x_fold, w_bd)

    # Unfold lanes back to (2,B,N,F_dim) and unsqueeze(-3): metadata-only.
    return out.reshape(2, B, N, f_dim)[:, :, None, :, :]


def reference(x, wr):
    """Pure-JAX mirror of the PyTorch forward."""
    projected = x @ wr.T
    emb = jnp.stack([jnp.cos(projected), jnp.sin(projected)], axis=0)
    emb = emb[:, :, None, :, :]                    # unsqueeze(-3)
    return jnp.repeat(emb, 2, axis=-1)             # repeat_interleave(2, -1)


if __name__ == "__main__":
    # LightGlue-like small config: M=2 keypoint coords, F_dim = head_dim = 64.
    B, N, M, dim, gamma = 2, 128, 2, 64, 1.0
    key = jax.random.PRNGKey(0)
    kx, kw = jax.random.split(key)
    x = jax.random.normal(kx, (B, N, M), jnp.float32)
    wr = (gamma ** -2) * jax.random.normal(kw, (dim // 2, M), jnp.float32)

    native = True
    try:
        out = jax.block_until_ready(learnable_fourier_pe(x, wr))
        tol = 2e-3
    except (pltpu.LoweringException, NotImplementedError):
        # Only hit on Mosaic builds without native sin/cos lowerings.
        native = False
        out = jax.block_until_ready(
            learnable_fourier_pe(x, wr, use_native_sincos=False))
        tol = 5e-3

    with jax.default_matmul_precision("highest"):
        ref = jax.block_until_ready(reference(x, wr))

    assert out.shape == (2, B, 1, N, dim), out.shape
    err = float(jnp.max(jnp.abs(out - ref)))
    assert err < tol, f"max abs err {err}"

    # Narrow-output path (write-bandwidth-bound op: bf16 halves HBM writeback).
    out_bf16 = jax.block_until_ready(
        learnable_fourier_pe(x, wr, out_dtype=jnp.bfloat16,
                             use_native_sincos=native))
    err_bf16 = float(jnp.max(jnp.abs(out_bf16.astype(jnp.float32) - ref)))
    assert err_bf16 < 1e-2, f"bf16 max abs err {err_bf16}"

    print("KERNEL_OK")
</pallas_src>

<mosaic_0001>
module attributes {stable_mosaic.version = 11 : i64} {
  func.func @_fourier_pe_kernel(%arg0: i32, %arg1: i32, %arg2: memref<1x64x4xf32, #tpu.memory_space<vmem>>, %arg3: memref<4x128xf32, #tpu.memory_space<vmem>>, %arg4: memref<2x1x64x128xf32, #tpu.memory_space<vmem>>) attributes {dimension_semantics = [#tpu.dimension_semantics<parallel>, #tpu.dimension_semantics<parallel>], iteration_bounds = array<i64: 2, 1>, scalar_prefetch = 0 : i64, scratch_operands = 0 : i64, tpu.core_type = #tpu.core_type<tc>, window_params = [{transform_indices = @transform_0, window_bounds = array<i64: 1, 64, 4>}, {pipeline_mode = #tpu.pipeline_mode<synchronous>, transform_indices = @transform_1, window_bounds = array<i64: 4, 128>}, {transform_indices = @transform_2, window_bounds = array<i64: 2, 1, 64, 128>}]} {
    %c0 = arith.constant 0 : index
    %c0_0 = arith.constant 0 : index
    %c0_1 = arith.constant 0 : index
    %0 = vector.load %arg2[%c0, %c0_0, %c0_1] : memref<1x64x4xf32, #tpu.memory_space<vmem>>, vector<1x64x4xf32>
    %1 = vector.shape_cast %0 : vector<1x64x4xf32> to vector<64x4xf32>
    %c0_2 = arith.constant 0 : index
    %c0_3 = arith.constant 0 : index
    %2 = vector.load %arg3[%c0_2, %c0_3] : memref<4x128xf32, #tpu.memory_space<vmem>>, vector<4x128xf32>
    %3 = vector.extract_strided_slice %1 {offsets = [0, 0], sizes = [64, 1], strides = [1, 1]} : vector<64x4xf32> to vector<64x1xf32>
    %4 = vector.extract_strided_slice %2 {offsets = [0, 0], sizes = [1, 128], strides = [1, 1]} : vector<4x128xf32> to vector<1x128xf32>
    %5 = vector.broadcast %3 : vector<64x1xf32> to vector<64x128xf32>
    %6 = vector.broadcast %4 : vector<1x128xf32> to vector<64x128xf32>
    %7 = arith.mulf %5, %6 : vector<64x128xf32>
    %8 = vector.extract_strided_slice %1 {offsets = [0, 1], sizes = [64, 1], strides = [1, 1]} : vector<64x4xf32> to vector<64x1xf32>
    %9 = vector.extract_strided_slice %2 {offsets = [1, 0], sizes = [1, 128], strides = [1, 1]} : vector<4x128xf32> to vector<1x128xf32>
    %10 = vector.broadcast %8 : vector<64x1xf32> to vector<64x128xf32>
    %11 = vector.broadcast %9 : vector<1x128xf32> to vector<64x128xf32>
    %12 = arith.mulf %10, %11 : vector<64x128xf32>
    %13 = arith.addf %7, %12 : vector<64x128xf32>
    %14 = vector.extract_strided_slice %1 {offsets = [0, 2], sizes = [64, 1], strides = [1, 1]} : vector<64x4xf32> to vector<64x1xf32>
    %15 = vector.extract_strided_slice %2 {offsets = [2, 0], sizes = [1, 128], strides = [1, 1]} : vector<4x128xf32> to vector<1x128xf32>
    %16 = vector.broadcast %14 : vector<64x1xf32> to vector<64x128xf32>
    %17 = vector.broadcast %15 : vector<1x128xf32> to vector<64x128xf32>
    %18 = arith.mulf %16, %17 : vector<64x128xf32>
    %19 = arith.addf %13, %18 : vector<64x128xf32>
    %20 = vector.extract_strided_slice %1 {offsets = [0, 3], sizes = [64, 1], strides = [1, 1]} : vector<64x4xf32> to vector<64x1xf32>
    %21 = vector.extract_strided_slice %2 {offsets = [3, 0], sizes = [1, 128], strides = [1, 1]} : vector<4x128xf32> to vector<1x128xf32>
    %22 = vector.broadcast %20 : vector<64x1xf32> to vector<64x128xf32>
    %23 = vector.broadcast %21 : vector<1x128xf32> to vector<64x128xf32>
    %24 = arith.mulf %22, %23 : vector<64x128xf32>
    %25 = arith.addf %19, %24 : vector<64x128xf32>
    %26 = math.sin %25 : vector<64x128xf32>
    %27 = math.cos %25 : vector<64x128xf32>
    %c0_4 = arith.constant 0 : index
    %c0_5 = arith.constant 0 : index
    %c0_6 = arith.constant 0 : index
    %c0_7 = arith.constant 0 : index
    %28 = vector.load %arg4[%c0_4, %c0_5, %c0_6, %c0_7] : memref<2x1x64x128xf32, #tpu.memory_space<vmem>>, vector<1x1x64x128xf32>
    %29 = vector.shape_cast %28 : vector<1x1x64x128xf32> to vector<64x128xf32>
    %30 = vector.shape_cast %27 : vector<64x128xf32> to vector<1x1x64x128xf32>
    tpu.vector_store %arg4[%c0_4, %c0_5, %c0_6, %c0_7], %30 {strides = array<i32>} : memref<2x1x64x128xf32, #tpu.memory_space<vmem>>, vector<1x1x64x128xf32>,
    %c1 = arith.constant 1 : index
    %c0_8 = arith.constant 0 : index
    %c0_9 = arith.constant 0 : index
    %c0_10 = arith.constant 0 : index
    %31 = vector.load %arg4[%c1, %c0_8, %c0_9, %c0_10] : memref<2x1x64x128xf32, #tpu.memory_space<vmem>>, vector<1x1x64x128xf32>
    %32 = vector.shape_cast %31 : vector<1x1x64x128xf32> to vector<64x128xf32>
    %33 = vector.shape_cast %26 : vector<64x128xf32> to vector<1x1x64x128xf32>
    tpu.vector_store %arg4[%c1, %c0_8, %c0_9, %c0_10], %33 {strides = array<i32>} : memref<2x1x64x128xf32, #tpu.memory_space<vmem>>, vector<1x1x64x128xf32>,
    return
  }
  func.func @transform_0(%arg0: i32, %arg1: i32) -> (i32, i32, i32) {
    %c0_i32 = arith.constant 0 : i32
    %c0_i32_0 = arith.constant 0 : i32
    return %arg0, %arg1, %c0_i32 : i32, i32, i32
  }
  func.func @transform_1(%arg0: i32, %arg1: i32) -> (i32, i32) {
    %c0_i32 = arith.constant 0 : i32
    %c0_i32_0 = arith.constant 0 : i32
    %c0_i32_1 = arith.constant 0 : i32
    return %c0_i32, %c0_i32_0 : i32, i32
  }
  func.func @transform_2(%arg0: i32, %arg1: i32) -> (i32, i32, i32, i32) {
    %c0_i32 = arith.constant 0 : i32
    %c0_i32_0 = arith.constant 0 : i32
    %c0_i32_1 = arith.constant 0 : i32
    return %c0_i32, %arg0, %arg1, %c0_i32_0 : i32, i32, i32, i32
  }
}

</mosaic_0001>

<bundles_post_ra>
// kernel: tpu_custom_call.1
= control target key start
LH: loop header
LB: loop body
LE: loop exit
PB: predicated region body
PF: predicated region fallthrough
CT: control target
= control target key end

     0   :  { %7 = vsyncpa [#allocation3], 0  ;;  %s4351_s0 = inlined_call_operand.vmem [shape: f32[2,64,4], index: 0, kind: input, shape index: {}]   ;;  %s4352_s1 = inlined_call_operand.vmem [shape: f32[4,128], index: 1, kind: input, shape index: {}]   ;;  %s4353_s2 = inlined_call_operand.hbm [shape: f32[2,2,64,128], index: 2, kind: output, shape index: {}]  }
   0x1   :  { %9 = vsyncpa [#allocation3 + $0x1], 0  ;;  %s3230_s9 = smov 0   ;;  %s3232_s10 = smov 0  }
   0x2   :  { %s3234_s11 = smov 0   ;;  %s3236_s12 = smov 0  }
   0x3   :  { %s3238_s13 = smov 0   ;;  %s3240_s14 = smov 0  }
   0x4 LB: > { %s2987_s15 = sadd.s32 4294967295, %s3197_s14   ;;  %s2988_s16 = sadd.s32 4294967294, %s3197_s14   ;;  %s3197_s14 = sphi %s3240_s14, %s15_s14   ;;  %s3193_s13 = sphi %s3238_s13, %s4372_s13   ;;  %s3189_s12 = sphi %s3236_s12, %s4371_s12   ;;  %s3185_s11 = sphi %s3234_s11, %s4370_s11   ;;  %s3181_s10 = sphi %s3232_s10, %s4369_s10   ;;  %s3177_s9 = sphi %s3230_s9, %s4368_s9  }
   0x5   : > { %s27_s17 = sadd.s32 1, %s3193_s13  ;;  %s85_s18 = sadd.s32 1, %s3185_s11 }
   0x6   : > { %p29_p0 = scmp.ge.s32.totalorder %s27_s17, 2  ;;  %p95_p1 = scmp.ne.s32.totalorder %s3185_s11, %s3181_s10 }
   0x7   : > { %p96_p2 = scmp.eq.s32.totalorder %s2987_s15, 1  ;;  %p101_p3 = scmp.ne.s32.totalorder %s3181_s10, %s3177_s9 }
   0x8   : > { %s4374_s17 = smov (%p29_p0, %s27_s17), 0  ;;  %p102_p5 = scmp.eq.s32.totalorder %s2988_s16, 1 }
   0x9   : > { %p3270_p4 = por %p96_p2, %p95_p1  ;;  %s80_s20 = ssub.s32 %s3193_s13, %s4374_s17 }
   0xa   : > { %p2991_p6 = scmp.ge.s32.totalorder %s3197_s14, 1  ;;  %p83_p7 = scmp.eq.s32.totalorder %s80_s20, 0 }
   0xb   : > { %p3277_p8 = por %p102_p5, %p101_p3  ;;  %p136_p9 = scmp.lt.s32.totalorder %s3197_s14, 3 }
   0xc   : > { %s3283_s22 = scalar_select %p83_p7, %s3185_s11, %s85_s18  }
   0xd   : > { %p137_p10 = pnand %p2991_p6, %p136_p9 }
   0xe   : > { %p163_p11 = scmp.lt.s32.totalorder (!%p137_p10), %s3189_s12, 1  ;;  %s159_s30 = sand.u32 (!%p137_p10), 1, %s3181_s10  }
   0xf   : > { %140 = sbr.rel (%p137_p10) target bundleno = 559 (0x22f), region = 28  ;;  %s2992_s3 = sshll.u32 (!%p137_p10), %s159_s30, 7 }
  0x10   : > { %s3603_s4 = scalar_lea.vmem (!%p137_p10), [#allocation2], %s2992_s3  ;;  %s2868_s5 = scalar_lea.sflag (!%p137_p10), [#allocation3], %s159_s30 }
  0x14   : > { %v3199_v0 = vmov 0   ;;  %s164_s23 = scalar_select %p163_p11, %s3189_s12, 1  ;;  %v3200_v9 = vmov 1   ;;  %v3201_v10 = vmov 2   ;;  %v3202_v11 = vmov 3  }
  0x15   : > { %3137 = vset.pattern.permute.xlu2 %v3199_v0  ;;  %3136 = vset.pattern.permute.xlu1 %v3199_v0  ;;  %v181_v12 = vld [vmem:[%s4352_s1] sm:$0xf] }
  0x16   : > { %3135 = vset.pattern.permute.xlu0 %v3199_v0  ;;  %s3056_s24 = sshll.u32 %s164_s23, 6  ;;  %v222_v13 = vperm.slane %v181_v12, 0  ;;  %v263_v23 = vperm.slane %v181_v12, 1  ;;  %v3301_v43 = vperm.slane %v181_v12, 2  ;;  %v3311_v57 = vperm.slane %v181_v12, 3 }
  0x17   : > { %s170_s27 = scalar_lea.vmem %s4351_s0, %s3056_s24 }
  0x18   : > { %v177_v1 = vld [vmem:[%s170_s27 + $0x20] sm:$0xff]  ;;  %v175_v2 = vld [vmem:[%s170_s27 + $0x10] sm:$0xff]  ;;  %v178_v4 = vld [vmem:[%s170_s27 + $0x28] sm:$0xff] }
  0x19   : > { %v173_v3 = vld [vmem:[%s170_s27] sm:$0xff]  ;;  %204 = vperm.xlu2 %3137, %v177_v1   ;;  %194 = vperm.xlu1 %3136, %v175_v2   ;;  %v176_v5 = vld [vmem:[%s170_s27 + $0x18] sm:$0xff]  ;;  %v174_v6 = vld [vmem:[%s170_s27 + $0x8] sm:$0xff] }
  0x1a   : > { %184 = vperm.xlu0 %3135, %v173_v3   ;;  %v180_v7 = vld [vmem:[%s170_s27 + $0x38] sm:$0xff]  ;;  %v179_v8 = vld [vmem:[%s170_s27 + $0x30] sm:$0xff] }
  0x21   : > { %209 = vperm.xlu2 %3137, %v178_v4   ;;  %199 = vperm.xlu1 %3136, %v176_v5  }
  0x22   : > { %189 = vperm.xlu0 %3135, %v174_v6  }
  0x29   : > { %3138 = vset.pattern.permute.xlu2 %v3200_v9  ;;  %219 = vperm.xlu1 %3136, %v180_v7  }
  0x2a   : > { %214 = vperm.xlu0 %3135, %v179_v8   ;;  %232 = vperm.xlu2 %3138, %v173_v3  }
  0x31   : > { %3140 = vset.pattern.permute.xlu1 %v3200_v9 }
  0x32   : > { %3139 = vset.pattern.permute.xlu0 %v3200_v9  ;;  %240 = vperm.xlu1 %3140, %v175_v2  }
  0x33   : > { %244 = vperm.xlu2 %3138, %v176_v5   ;;  %236 = vperm.xlu0 %3139, %v174_v6  }
  0x3a   : > { %248 = vperm.xlu1 %3140, %v177_v1  }
  0x3b   : > { %252 = vperm.xlu2 %3138, %v178_v4   ;;  %256 = vperm.xlu0 %3139, %v179_v8  }
  0x42   : > { %260 = vperm.xlu1 %3140, %v180_v7  }
  0x43   : > { %3141 = vset.pattern.permute.xlu2 %v3201_v10  ;;  %3142 = vset.pattern.permute.xlu0 %v3201_v10 }
  0x44   : > { %281 = vperm.xlu2 %3141, %v173_v3   ;;  %285 = vperm.xlu0 %3142, %v174_v6  }
  0x4a   : > { %3143 = vset.pattern.permute.xlu1 %v3201_v10 }
  0x4b   : > { %289 = vperm.xlu1 %3143, %v175_v2  }
  0x4c   : > { %293 = vperm.xlu2 %3141, %v176_v5   ;;  %305 = vperm.xlu0 %3142, %v179_v8  }
  0x53   : > { %297 = vperm.xlu1 %3143, %v177_v1  }
  0x54   : > { %301 = vperm.xlu2 %3141, %v178_v4   ;;  %3145 = vset.pattern.permute.xlu0 %v3202_v11 }
  0x55   : > { %334 = vperm.xlu0 %3145, %v174_v6  }
  0x5b   : > { %309 = vperm.xlu1 %3143, %v180_v7  }
  0x5c   : > { %3144 = vset.pattern.permute.xlu2 %v3202_v11 }
  0x5d   : > { %330 = vperm.xlu2 %3144, %v173_v3   ;;  %354 = vperm.xlu0 %3145, %v179_v8  }
  0x63   : > { %3146 = vset.pattern.permute.xlu1 %v3202_v11 }
  0x64   : > { %338 = vperm.xlu1 %3146, %v175_v2  }
  0x65   : > { %342 = vperm.xlu2 %3144, %v176_v5  }
  0x6c   : > { %346 = vperm.xlu1 %3146, %v177_v1  }
  0x6d   : > { %350 = vperm.xlu2 %3144, %v178_v4  }
  0x73   : > { %v205_v14 = vpop.permute.xlu2 %204 }
  0x74   : > { %v227_v15 = vmul.f32 %v222_v13, %v205_v14  ;;  %358 = vperm.xlu1 %3146, %v180_v7  }
  0x7b   : > { %v210_v16 = vpop.permute.xlu2 %209 }
  0x7c   : > { %v228_v17 = vmul.f32 %v222_v13, %v210_v16 }
  0x84   : > { %v233_v18 = vpop.permute.xlu2 %232 }
  0x85   : > { %v264_v50 = vmul.f32 %v263_v23, %v233_v18 }
  0x8b   : > { %v195_v19 = vpop.permute.xlu1 %194 }
  0x8c   : > { %v225_v20 = vmul.f32 %v222_v13, %v195_v19  ;;  %v185_v21 = vpop.permute.xlu0 %184 }
  0x8d   : > { %v245_v22 = vpop.permute.xlu2 %244  ;;  %v223_v51 = vmul.f32 %v222_v13, %v185_v21 }
  0x8e   : > { %v267_v63 = vmul.f32 %v263_v23, %v245_v22 }
  0x8f   : > { %v272_v54 = vadd.f32 %v264_v50, %v223_v51 }
  0x93   : > { %v200_v24 = vpop.permute.xlu1 %199 }
  0x94   : > { %v190_v25 = vpop.permute.xlu0 %189  ;;  %v226_v1 = vmul.f32 %v222_v13, %v200_v24 }
  0x95   : > { %v253_v26 = vpop.permute.xlu2 %252  ;;  %v224_v34 = vmul.f32 %v222_v13, %v190_v25 }
  0x96   : > { %v269_v27 = vmul.f32 %v263_v23, %v253_v26  ;;  %v275_v6 = vadd.f32 %v267_v63, %v226_v1  ;;  %v3203_v26 = vmov 683565275  }
  0x98   : > { %v277_v28 = vadd.f32 %v269_v27, %v228_v17 }
  0x9b   : > { %v220_v29 = vpop.permute.xlu1 %219 }
  0x9c   : > { %v230_v30 = vmul.f32 %v222_v13, %v220_v29  ;;  %v215_v31 = vpop.permute.xlu0 %214 }
  0x9d   : > { %v229_v32 = vmul.f32 %v222_v13, %v215_v31 }
  0x9e   : > { %v282_v33 = vpop.permute.xlu2 %281 }
  0x9f   : > { %v313_v55 = vmul.f32 %v3301_v43, %v282_v33 }
  0xa1   : > { %v321_v61 = vadd.f32 %v313_v55, %v272_v54 }
  0xa4   : > { %v241_v35 = vpop.permute.xlu1 %240 }
  0xa5   : > { %v266_v36 = vmul.f32 %v263_v23, %v241_v35  ;;  %v237_v37 = vpop.permute.xlu0 %236  ;;  %v3206_v35 = vmov 2102212464  }
  0xa6   : > { %v265_v38 = vmul.f32 %v263_v23, %v237_v37  ;;  %v294_v39 = vpop.permute.xlu2 %293 }
  0xa7   : > { %v3297_v40 = vadd.f32 %v266_v36, %v225_v20  ;;  %v316_v3 = vmul.f32 %v3301_v43, %v294_v39 }
  0xa8   : > { %v3299_v41 = vadd.f32 %v265_v38, %v224_v34  ;;  %v3207_v38 = vmov 920167782  }
  0xa9   : > { %v324_v10 = vadd.f32 %v316_v3, %v275_v6 }
  0xac   : > { %v249_v42 = vpop.permute.xlu1 %248 }
  0xad   : > { %v268_v44 = vmul.f32 %v263_v23, %v249_v42  ;;  %v257_v45 = vpop.permute.xlu0 %256 }
  0xae   : > { %v270_v46 = vmul.f32 %v263_v23, %v257_v45  ;;  %v302_v47 = vpop.permute.xlu2 %301 }
  0xaf   : > { %v3303_v48 = vadd.f32 %v268_v44, %v227_v15  ;;  %v318_v49 = vmul.f32 %v3301_v43, %v302_v47  ;;  %v3208_v44 = vmov 1326507024  }
  0xb0   : > { %v3306_v52 = vadd.f32 %v270_v46, %v229_v32  ;;  %v3205_v32 = vmov 2131351028  }
  0xb1   : > { %v3308_v53 = vadd.f32 %v318_v49, %v277_v28  ;;  %v3204_v28 = vmov 2475754826  }
  0xb4   : > { %v261_v56 = vpop.permute.xlu1 %260 }
  0xb5   : > { %v271_v58 = vmul.f32 %v263_v23, %v261_v56 }
  0xb7   : > { %v3313_v59 = vadd.f32 %v271_v58, %v230_v30  ;;  %v331_v60 = vpop.permute.xlu2 %330 }
  0xb8   : > { %v362_v62 = vmul.f32 %v3311_v57, %v331_v60 }
  0xba   : > { %v3316_v2 = vadd.f32 %v362_v62, %v321_v61 }
  0xbc   : > { %v378_v4 = vand.u32 2147483647, %v3316_v2  ;;  %v381_v5 = vand.u32 2139095040, %v3316_v2 }
  0xbe   : > { %v382_v7 = vshrl.u32 %v381_v5, 23  ;;  %v385_v8 = vand.u32 8388607, %v378_v4 }
  0xbf   : > { %v343_v9 = vpop.permute.xlu2 %342 }
  0xc0   : > { %v2995_v11 = vadd.s32 4294967169, %v382_v7  ;;  %v386_v12 = vor.u32 8388608, %v385_v8  ;;  %v365_v14 = vmul.f32 %v3311_v57, %v343_v9 }
  0xc2   : > { %v388_v13 = vadd.s32 1, %v2995_v11  ;;  %v3324_v15 = vadd.f32 %v365_v14, %v324_v10  ;;  %v3326_v16 = vshll.u32 %v386_v12, 8 }
  0xc4   : > { %vm389_vm0 = vcmp.gt.s32.totalorder %v388_v13, 0  ;;  %v843_v18 = vand.u32 2147483647, %v3324_v15  ;;  %v846_v19 = vand.u32 2139095040, %v3324_v15  ;;  %v427_v22 = vand.u32 65535, %v3326_v16 }
  0xc5   : > { %v390_v17 = vsel %vm389_vm0, %v388_v13, 0  ;;  %v428_v23 = vshrl.u32 %v3326_v16, 16 }
  0xc6   : > { %v392_v20 = vand.u32 31, %v390_v17  ;;  %v847_v24 = vshrl.u32 %v846_v19, 23  ;;  %v391_v25 = vshrl.u32 %v390_v17, 5  ;;  %v3336_v30 = vand.u32 8388607, %v843_v18 }
  0xc8   : > { %v393_v21 = vsub.s32 32, %v392_v20  ;;  %v395_v27 = vshll.u32 %v3203_v26, %v392_v20  ;;  %v398_v29 = vshll.u32 %v3204_v28, %v392_v20  ;;  %v401_v34 = vshll.u32 %v3205_v32, %v392_v20 }
  0xc9   : > { %v404_v37 = vshll.u32 %v3206_v35, %v392_v20  ;;  %v407_v42 = vshll.u32 %v3207_v38, %v392_v20  ;;  %v3004_v50 = vadd.s32 4294967169, %v847_v24  ;;  %vm410_vm1 = vcmp.lt.s32.totalorder %v391_v25, 1 }
  0xca   : > { %v396_v31 = vshrl.u32 %v3204_v28, %v393_v21  ;;  %v399_v33 = vshrl.u32 %v3205_v32, %v393_v21  ;;  %v402_v36 = vshrl.u32 %v3206_v35, %v393_v21  ;;  %v405_v39 = vshrl.u32 %v3207_v38, %v393_v21 }
  0xcb   : > { %v408_v45 = vshrl.u32 %v3208_v44, %v393_v21  ;;  %vm413_vm2 = vcmp.lt.s32.totalorder %v391_v25, 4  ;;  %v394_v55 = vshrl.u32 %v3203_v26, %v393_v21  ;;  %vm412_vm3 = vcmp.lt.s32.totalorder %v391_v25, 3 }
  0xcc   : > { %v397_v46 = vor.u32 %v396_v31, %v395_v27  ;;  %v400_v47 = vor.u32 %v399_v33, %v398_v29  ;;  %v403_v49 = vor.u32 %v402_v36, %v401_v34  ;;  %v406_v51 = vor.u32 %v405_v39, %v404_v37 }
  0xcd   : > { %v409_v54 = vor.u32 %v408_v45, %v407_v42  ;;  %v853_v63 = vadd.s32 1, %v3004_v50  ;;  %vm411_vm4 = vcmp.lt.s32.totalorder %v391_v25, 2  ;;  %v851_v14 = vor.u32 8388608, %v3336_v30 }
  0xce   : > { %v415_v56 = vsel %vm413_vm2, %v403_v49, 2102212464  ;;  %v418_v58 = vsel %vm410_vm1, %v397_v46, %v400_v47  ;;  %v422_v60 = vsel %vm410_vm1, %v400_v47, %v403_v49  ;;  %v419_v61 = vsel %vm413_vm2, %v406_v51, 920167782 }
  0xcf   : > { %v423_v62 = vsel %vm413_vm2, %v409_v54, 1326507024  ;;  %v414_v1 = vsel %vm410_vm1, %v394_v55, %v397_v46  ;;  %v420_v3 = vsel %vm412_vm3, %v403_v49, %v419_v61  ;;  %v416_v6 = vsel %vm412_vm3, %v400_v47, %v415_v56 }
  0xd0   : > { %v424_v5 = vsel %vm412_vm3, %v406_v51, %v423_v62  ;;  %v421_v7 = vsel %vm411_vm4, %v418_v58, %v420_v3  ;;  %vm854_vm5 = vcmp.gt.s32.totalorder %v853_v63, 0  ;;  %v3348_v13 = vsel %vm411_vm4, %v414_v1, %v416_v6 }
  0xd1   : > { %v425_v8 = vsel %vm411_vm4, %v422_v60, %v424_v5  ;;  %v451_v11 = vand.u32 65535, %v421_v7  ;;  %v452_v12 = vshrl.u32 %v421_v7, 16  ;;  %v855_v20 = vsel %vm854_vm5, %v853_v63, 0 }
  0xd2   : > { %v429_v9 = vand.u32 65535, %v425_v8  ;;  %v430_v10 = vshrl.u32 %v425_v8, 16  ;;  %v857_v46 = vand.u32 31, %v855_v20  ;;  %v3355_v56 = vshrl.u32 %v855_v20, 5 }
  0xd3   : > { %v454_v25 = vmul.u32 %v452_v12, %v427_v22  ;;  %v455_v27 = vmul.u32 %v451_v11, %v428_v23  ;;  %v453_v33 = vmul.u32 %v451_v11, %v427_v22  ;;  %v456_v34 = vmul.u32 %v452_v12, %v428_v23 }
  0xd4   : > { %v432_v17 = vmul.u32 %v430_v10, %v427_v22  ;;  %v433_v19 = vmul.u32 %v429_v9, %v428_v23  ;;  %v431_v21 = vmul.u32 %v429_v9, %v427_v22  ;;  %v434_v24 = vmul.u32 %v430_v10, %v428_v23 }
  0xd5   : > { %v457_v39 = vshll.u32 %v454_v25, 16  ;;  %v458_v42 = vshrl.u32 %v454_v25, 16  ;;  %v459_v30 = vshll.u32 %v455_v27, 16  ;;  %v460_v49 = vshrl.u32 %v455_v27, 16 }
  0xd6   : > { %v435_v29 = vshll.u32 %v432_v17, 16  ;;  %v436_v31 = vshrl.u32 %v432_v17, 16  ;;  %v437_v36 = vshll.u32 %v433_v19, 16  ;;  %v438_v37 = vshrl.u32 %v433_v19, 16 }
  0xd7   : > { %vm461_vm7 = vc.u32 %v453_v33, %v457_v39  ;;  %v463_v50 = vadd.s32 %v457_v39, %v453_v33  ;;  %v3352_v55 = vsub.s32 32, %v857_v46  ;;  %v860_v62 = vshll.u32 %v3203_v26, %v857_v46 }
  0xd8   : > { %vm439_vm6 = vc.u32 %v431_v21, %v435_v29  ;;  %v441_v45 = vadd.s32 %v435_v29, %v431_v21  ;;  %v462_v54 = vsel %vm461_vm7, 1, %v3199_v0  ;;  %v863_v3 = vshll.u32 %v3204_v28, %v857_v46 }
  0xd9   : > { %v440_v47 = vsel %vm439_vm6, 1, %v3199_v0  ;;  %v464_v23 = vadd.s32 %v462_v54, %v456_v34  ;;  %vm465_vm9 = vc.u32 %v463_v50, %v459_v30  ;;  %v3358_v61 = vadd.s32 %v463_v50, %v459_v30 }
  0xda   : > { %v442_v51 = vadd.s32 %v440_v47, %v434_v24  ;;  %vm443_vm8 = vc.u32 %v441_v45, %v437_v36  ;;  %v466_v60 = vsel %vm465_vm9, 1, %v3199_v0  ;;  %v861_v1 = vshrl.u32 %v3204_v28, %v3352_v55 }
  0xdb   : > { %v444_v22 = vsel %vm443_vm8, 1, %v3199_v0  ;;  %v468_v63 = vadd.s32 %v466_v60, %v464_v23  ;;  %v864_v5 = vshrl.u32 %v3205_v32, %v3352_v55  ;;  %v866_v7 = vshll.u32 %v3205_v32, %v857_v46 }
  0xdc   : > { %v446_v58 = vadd.s32 %v444_v22, %v442_v51  ;;  %v867_v8 = vshrl.u32 %v3206_v35, %v3352_v55  ;;  %v869_v9 = vshll.u32 %v3206_v35, %v857_v46  ;;  %v3370_v11 = vor.u32 %v861_v1, %v860_v62 }
  0xdd   : > { %v469_v10 = vadd.s32 %v468_v63, %v458_v42  ;;  %v3372_v12 = vor.u32 %v864_v5, %v863_v3  ;;  %v870_v17 = vshrl.u32 %v3207_v38, %v3352_v55  ;;  %v872_v21 = vshll.u32 %v3207_v38, %v857_v46  ;;  %v351_v63 = vpop.permute.xlu2 %350 }
  0xde   : > { %v447_v6 = vadd.s32 %v446_v58, %v436_v31  ;;  %v868_v20 = vor.u32 %v867_v8, %v866_v7  ;;  %v873_v24 = vshrl.u32 %v3208_v44, %v3352_v55  ;;  %vm875_vm11 = vcmp.lt.s32.totalorder %v3355_v56, 1 }
  0xdf   : > { %v470_v25 = vadd.s32 %v469_v10, %v460_v49  ;;  %v871_v27 = vor.u32 %v870_v17, %v869_v9  ;;  %v3384_v31 = vshll.u32 %v851_v14, 8  ;;  %v471_v33 = vmul.u32 %v3326_v16, %v3348_v13  ;;  %v3411_v49 = vpop.permute.xlu0 %285 }
  0xe0   : > { %v3376_v19 = vadd.s32 %v447_v6, %v438_v37  ;;  %v874_v29 = vor.u32 %v873_v24, %v872_v21  ;;  %vm878_vm12 = vcmp.lt.s32.totalorder %v3355_v56, 4  ;;  %v883_v36 = vsel %vm875_vm11, %v3370_v11, %v3372_v12 }
  0xe1   : > { %v474_v34 = vadd.s32 1, %v470_v25  ;;  %vm877_vm13 = vcmp.lt.s32.totalorder %v3355_v56, 3  ;;  %v884_v37 = vsel %vm878_vm12, %v871_v27, 920167782  ;;  %v887_v14 = vsel %vm875_vm11, %v3372_v12, %v868_v20 }
  0xe2   : > { %vm473_vm10 = vc.u32 %v3376_v19, %v3358_v61  ;;  %v888_v16 = vsel %vm878_vm12, %v874_v29, 1326507024  ;;  %vm876_vm14 = vcmp.lt.s32.totalorder %v3355_v56, 2  ;;  %v885_v39 = vsel %vm877_vm13, %v868_v20, %v884_v37 }
  0xe3   : > { %v475_v13 = vsel %vm473_vm10, %v474_v34, %v470_v25  ;;  %v889_v42 = vsel %vm877_vm13, %v871_v27, %v888_v16  ;;  %v886_v30 = vsel %vm876_vm14, %v883_v36, %v885_v39  ;;  %v892_v47 = vand.u32 65535, %v3384_v31 }
  0xe4   : > { %v476_v45 = vadd.s32 %v475_v13, %v471_v33  ;;  %v890_v46 = vsel %vm876_vm14, %v887_v14, %v889_v42  ;;  %v893_v50 = vshrl.u32 %v3384_v31, 16  ;;  %v917_v22 = vshrl.u32 %v886_v30, 16 }
  0xe5   : > { %v894_v51 = vand.u32 65535, %v890_v46  ;;  %v895_v54 = vshrl.u32 %v890_v46, 16  ;;  %v916_v62 = vand.u32 65535, %v886_v30  ;;  %v367_v10 = vmul.f32 %v3311_v57, %v351_v63 }
  0xe6   : > { %v477_v23 = vadd.s32 536870912, %v476_v45  ;;  %v919_v3 = vmul.u32 %v917_v22, %v892_v47  ;;  %v880_v36 = vsel %vm878_vm12, %v868_v20, 2102212464  ;;  %v921_v13 = vmul.u32 %v917_v22, %v893_v50 }
  0xe7   : > { %v897_v58 = vmul.u32 %v895_v54, %v892_v47  ;;  %v898_v60 = vmul.u32 %v894_v51, %v893_v50  ;;  %v896_v5 = vmul.u32 %v894_v51, %v892_v47  ;;  %v899_v8 = vmul.u32 %v895_v54, %v893_v50  ;;  %v3421_v14 = vpop.permute.xlu0 %305 }
  0xe8   : > { %v478_v1 = vshrl.u32 %v477_v23, 30  ;;  %v922_v9 = vshll.u32 %v919_v3, 16  ;;  %v918_v24 = vmul.u32 %v916_v62, %v892_v47  ;;  %v920_v29 = vmul.u32 %v916_v62, %v893_v50 }
  0xe9   : > { %v900_v6 = vshll.u32 %v897_v58, 16  ;;  %v902_v17 = vshll.u32 %v898_v60, 16  ;;  %v3419_v37 = vadd.f32 %v367_v10, %v3308_v53  ;;  %vm380_vm3 = vcmp.lt.s32.totalorder %v3316_v2, 0 }
  0xea   : > { %v479_v7 = vshll.u32 %v478_v1, 30  ;;  %vm926_vm1 = vc.u32 %v918_v24, %v922_v9  ;;  %v928_v42 = vadd.s32 %v922_v9, %v918_v24  ;;  %v859_v30 = vshrl.u32 %v3203_v26, %v3352_v55 }
  0xeb   : > { %vm904_vm15 = vc.u32 %v896_v5, %v900_v6  ;;  %v906_v21 = vadd.s32 %v900_v6, %v896_v5  ;;  %v927_v39 = vsel %vm926_vm1, 1, %v3199_v0  ;;  %v924_v46 = vshll.u32 %v920_v29, 16 }
  0xec   : > { %v480_v25 = vsub.s32 %v476_v45, %v479_v7  ;;  %v905_v27 = vsel %vm904_vm15, 1, %v3199_v0  ;;  %v901_v20 = vshrl.u32 %v897_v58, 16  ;;  %v929_v53 = vadd.s32 %v927_v39, %v921_v13 }
  0xed   : > { %v907_v33 = vadd.s32 %v905_v27, %v899_v8  ;;  %vm908_vm0 = vc.u32 %v906_v21, %v902_v17  ;;  %v879_v54 = vsel %vm875_vm11, %v859_v30, %v3370_v11  ;;  %v881_v50 = vsel %vm877_vm13, %v3372_v12, %v880_v36 }
  0xee   : > { %vm481_vm2 = vcmp.lt.s32.totalorder %v480_v25, 0  ;;  %v482_v34 = vsub.s32 0, %v480_v25  ;;  %v909_v16 = vsel %vm908_vm0, 1, %v3199_v0  ;;  %vm930_vm4 = vc.u32 %v928_v42, %v924_v46 }
  0xef   : > { %v911_v51 = vadd.s32 %v909_v16, %v907_v33  ;;  %v1153_v22 = vand.u32 2147483647, %v3419_v37  ;;  %v903_v62 = vshrl.u32 %v898_v60, 16  ;;  %v931_v55 = vsel %vm930_vm4, 1, %v3199_v0 }
  0xf0   : > { %v483_v45 = vsel %vm481_vm2, %v482_v34, %v480_v25  ;;  %v502_v5 = vsub.s32 4, %v478_v1  ;;  %v923_v58 = vshrl.u32 %v919_v3, 16  ;;  %v933_v6 = vadd.s32 %v931_v55, %v929_v53 }
  0xf1   : > { %v484_v47 = vclz %v483_v45  ;;  %v912_v63 = vadd.s32 %v911_v51, %v901_v20  ;;  %v1156_v7 = vand.u32 2139095040, %v3419_v37  ;;  %v472_v11 = vadd.s32 %v3358_v61, %v3376_v19 }
  0xf2   : > { %v882_v12 = vsel %vm876_vm14, %v879_v54, %v881_v50  ;;  %v925_v10 = vshrl.u32 %v920_v29, 16  ;;  %v934_v17 = vadd.s32 %v933_v6, %v923_v58  ;;  %v932_v27 = vadd.s32 %v928_v42, %v924_v46  ;;  %v335_v29 = vpop.permute.xlu0 %334 }
  0xf3   : > { %v2996_v23 = vadd.s32 4294967294, %v484_v47  ;;  %v913_v8 = vadd.s32 %v912_v63, %v903_v62  ;;  %v1157_v60 = vshrl.u32 %v1156_v7, 23  ;;  %v1160_v3 = vand.u32 8388607, %v1153_v22 }
  0xf4   : > { %v314_v33 = vmul.f32 %v3301_v43, %v3411_v49  ;;  %v503_v61 = vsel %vm380_vm3, %v502_v5, %v478_v1  ;;  %v935_v19 = vadd.s32 %v934_v17, %v925_v10  ;;  %vm3449_vm7 = vcmp.le.f32.partialorder %v378_v4, 0.7853982 }
  0xf5   : > { %vm2997_vm5 = vcmp.lt.s32.totalorder %v2996_v23, 0  ;;  %v3010_v56 = vadd.s32 4294967169, %v1157_v60  ;;  %vm938_vm6 = vc.u32 %v913_v8, %v932_v27  ;;  %v936_v39 = vmul.u32 %v3384_v31, %v882_v12 }
  0xf6   : > { %v487_v9 = vsel %vm2997_vm5, 0, %v2996_v23  ;;  %v939_v42 = vadd.s32 1, %v935_v19  ;;  %v505_v1 = vsel %vm3449_vm7, 0, %v503_v61  ;;  %v363_v47 = vmul.f32 %v3311_v57, %v335_v29 }
  0xf7   : > { %v488_v21 = vsub.s32 32, %v487_v9  ;;  %v492_v24 = vsub.s32 4294967266, %v487_v9  ;;  %v489_v34 = vshll.u32 %v480_v25, %v487_v9  ;;  %v1163_v49 = vadd.s32 1, %v3010_v56 }
  0xf8   : > { %v1161_v25 = vor.u32 8388608, %v1160_v3  ;;  %v940_v46 = vsel %vm938_vm6, %v939_v42, %v935_v19  ;;  %v322_v53 = vadd.f32 %v314_v33, %v3299_v41  ;;  %v522_v54 = vadd.s32 3, %v505_v1 }
  0xf9   : > { %v490_v36 = vshrl.u32 %v472_v11, %v488_v21  ;;  %v493_v16 = vadd.s32 127, %v492_v24  ;;  %vm1164_vm8 = vcmp.gt.s32.totalorder %v1163_v49, 0  ;;  %v941_v51 = vadd.s32 %v940_v46, %v936_v39 }
  0xfa   : > { %v1165_v4 = vsel %vm1164_vm8, %v1163_v49, 0  ;;  %v3458_v63 = vshll.u32 %v1161_v25, 8  ;;  %v3462_v5 = vadd.f32 %v363_v47, %v322_v53  ;;  %v3464_v7 = vand.u32 3, %v522_v54 }
  0xfb   : > { %v491_v45 = vor.u32 %v490_v36, %v489_v34  ;;  %v494_v30 = vshll.u32 %v493_v16, 23  ;;  %v1167_v50 = vand.u32 31, %v1165_v4  ;;  %v942_v62 = vadd.s32 536870912, %v941_v51 }
  0xfc   : > { %v3466_v11 = vand.u32 3, %v505_v1  ;;  %vm845_vm9 = vcmp.lt.s32.totalorder %v3324_v15, 0  ;;  %v3469_v41 = vadd.s32 %v932_v27, %v913_v8  ;;  %v3472_v10 = vand.u32 65535, %v3458_v63 }
  0xfd   : > { %v495_v20 = vor.u32 4788187, %v494_v30  ;;  %v498_v23 = vcvt.s32.f32 %v491_v45  ;;  %v3460_v55 = vsub.s32 32, %v1167_v50  ;;  %v943_v6 = vshrl.u32 %v942_v62, 30  ;;  %v3520_v62 = vpop.permute.xlu1 %289 }
  0xfe   : > { %v3475_v17 = vshrl.u32 %v3458_v63, 16  ;;  %v3477_v60 = vshrl.u32 %v1165_v4, 5  ;;  %v533_v24 = vand.u32 2147483647, %v3462_v5  ;;  %v536_v3 = vand.u32 2139095040, %v3462_v5 }
  0xff   : > { %v496_v31 = vand.u32 2147483647, %v495_v20  ;;  %v944_v9 = vshll.u32 %v943_v6, 30  ;;  %v1171_v21 = vshrl.u32 %v3204_v28, %v3460_v55  ;;  %v1170_v33 = vshll.u32 %v3203_v26, %v1167_v50 }
 0x100   : > { %v1174_v61 = vshrl.u32 %v3205_v32, %v3460_v55  ;;  %v1173_v56 = vshll.u32 %v3204_v28, %v1167_v50  ;;  %v1177_v34 = vshrl.u32 %v3206_v35, %v3460_v55  ;;  %v1180_v36 = vshrl.u32 %v3207_v38, %v3460_v55 }
 0x101   : > { %v499_v58 = vmul.f32 %v498_v23, %v496_v31  ;;  %v3485_v27 = vsub.s32 %v941_v51, %v944_v9  ;;  %v967_v39 = vsub.s32 4, %v943_v6  ;;  %v3504_v42 = vor.u32 %v1171_v21, %v1170_v33 }
 0x102   : > { %v1176_v13 = vshll.u32 %v3205_v32, %v1167_v50  ;;  %v1179_v49 = vshll.u32 %v3206_v35, %v1167_v50  ;;  %v1183_v45 = vshrl.u32 %v3208_v44, %v3460_v55  ;;  %v3511_v46 = vor.u32 %v1174_v61, %v1173_v56 }
 0x103   : > { %v500_v12 = vxor.u32 2147483648, %v499_v58  ;;  %vm946_vm10 = vcmp.lt.s32.totalorder %v3485_v27, 0  ;;  %v947_v29 = vsub.s32 0, %v3485_v27  ;;  %v1182_v4 = vshll.u32 %v3207_v38, %v1167_v50 }
 0x104   : > { %v3513_v20 = vor.u32 %v1177_v34, %v1176_v13  ;;  %v1181_v51 = vor.u32 %v1180_v36, %v1179_v49  ;;  %v968_v31 = vsel %vm845_vm9, %v967_v39, %v943_v6  ;;  %v3518_v23 = vshrl.u32 %v536_v3, 23 }
 0x105   : > { %v501_v8 = vsel %vm380_vm3, %v500_v12, %v499_v58  ;;  %v948_v25 = vsel %vm946_vm10, %v947_v29, %v3485_v27  ;;  %vm3524_vm11 = vcmp.le.f32.partialorder %v843_v18, 0.7853982  ;;  %v1184_v9 = vor.u32 %v1183_v45, %v1182_v4 }
 0x106   : > { %v3493_v19 = vsel %vm3449_vm7, %v3316_v2, %v501_v8  ;;  %v949_v47 = vclz %v948_v25  ;;  %vm1185_vm12 = vcmp.lt.s32.totalorder %v3477_v60, 1  ;;  %vm1186_vm13 = vcmp.lt.s32.totalorder %v3477_v60, 2 }
 0x107   : > { %v506_v16 = vmul.f32 %v3493_v19, %v3493_v19  ;;  %vm1188_vm14 = vcmp.lt.s32.totalorder %v3477_v60, 4  ;;  %v1193_v6 = vsel %vm1185_vm12, %v3504_v42, %v3511_v46  ;;  %vm1187_vm0 = vcmp.lt.s32.totalorder %v3477_v60, 3 }
 0x108   : > { %v3005_v12 = vadd.s32 4294967294, %v949_v47  ;;  %v1194_v18 = vsel %vm1188_vm14, %v1181_v51, 920167782  ;;  %v1197_v3 = vsel %vm1185_vm12, %v3511_v46, %v3513_v20  ;;  %vm528_vm1 = vcmp.eq.s32.totalorder %v3464_v7, 2 }
 0x109   : > { %v507_v30 = vmul.f32 -0.001358992, %v506_v16  ;;  %v514_v1 = vmul.f32 -0.00019511016, %v506_v16  ;;  %vm1767_vm2 = vcmp.eq.s32.totalorder %v3466_v11, 2  ;;  %v1195_v56 = vsel %vm1187_vm0, %v3513_v20, %v1194_v18 }
 0x10a   : > { %vm3006_vm15 = vcmp.lt.s32.totalorder %v3005_v12, 0  ;;  %vm525_vm3 = vcmp.eq.s32.totalorder %v3464_v7, 0  ;;  %vm1764_vm4 = vcmp.eq.s32.totalorder %v3466_v11, 0  ;;  %v1196_v39 = vsel %vm1186_vm13, %v1193_v6, %v1195_v56 }
 0x10b   : > { %v508_v53 = vadd.f32 0.041655596, %v507_v30  ;;  %v515_v54 = vadd.f32 0.008332121, %v514_v1  ;;  %v952_v61 = vsel %vm3006_vm15, 0, %v3005_v12  ;;  %vm524_vm5 = vcmp.lt.s32.totalorder %v3464_v7, 2 }
 0x10c   : > { %v953_v34 = vsub.s32 32, %v952_v61  ;;  %v954_v36 = vshll.u32 %v3485_v27, %v952_v61  ;;  %v957_v29 = vsub.s32 4294967266, %v952_v61  ;;  %vm1763_vm6 = vcmp.lt.s32.totalorder %v3466_v11, 2 }
 0x10d   : > { %v509_v50 = vmul.f32 %v508_v53, %v506_v16  ;;  %v516_v21 = vmul.f32 %v515_v54, %v506_v16  ;;  %v1198_v45 = vsel %vm1188_vm14, %v1184_v9, 1326507024  ;;  %v1226_v30 = vand.u32 65535, %v1196_v39 }
 0x10e   : > { %vm521_vm7 = vweird.f32 %v3316_v2  ;;  %v955_v1 = vshrl.u32 %v3469_v41, %v953_v34  ;;  %v958_v27 = vadd.s32 127, %v957_v29  ;;  %v1199_v25 = vsel %vm1187_vm0, %v1181_v51, %v1198_v45 }
 0x10f   : > { %v510_v8 = vadd.f32 -0.4999988, %v509_v50  ;;  %v517_v33 = vadd.f32 -0.16666654, %v516_v21  ;;  %v1227_v47 = vshrl.u32 %v1196_v39, 16  ;;  %v1169_v53 = vshrl.u32 %v3203_v26, %v3460_v55 }
 0x110   : > { %v1200_v54 = vsel %vm1186_vm13, %v1197_v3, %v1199_v25  ;;  %v956_v12 = vor.u32 %v955_v1, %v954_v36  ;;  %v959_v9 = vshll.u32 %v958_v27, 23  ;;  %v3567_v18 = vsel %vm3524_vm11, 0, %v968_v31  ;;  %v3576_v3 = vpop.permute.xlu1 %297 }
 0x111   : > { %v511_v13 = vmul.f32 %v510_v8, %v506_v16  ;;  %v518_v49 = vmul.f32 %v517_v33, %v506_v16  ;;  %v1204_v50 = vand.u32 65535, %v1200_v54  ;;  %v1205_v21 = vshrl.u32 %v1200_v54, 16 }
 0x112   : > { %v3572_v51 = vsel %vm1185_vm12, %v1169_v53, %v3504_v42  ;;  %v960_v55 = vor.u32 4788187, %v959_v9  ;;  %v1229_v33 = vmul.u32 %v1227_v47, %v3472_v10  ;;  %v963_v31 = vcvt.s32.f32 %v956_v12 }
 0x113   : > { %v512_v4 = vadd.f32 1.0, %v511_v13  ;;  %v519_v16 = vadd.f32 1.0, %v518_v49  ;;  %v1207_v8 = vmul.u32 %v1205_v21, %v3472_v10  ;;  %v1206_v56 = vmul.u32 %v1204_v50, %v3472_v10 }
 0x114   : > { %v1208_v34 = vmul.u32 %v1204_v50, %v3475_v17  ;;  %v961_v29 = vand.u32 2147483647, %v960_v55  ;;  %v1209_v45 = vmul.u32 %v1205_v21, %v3475_v17  ;;  %v1228_v11 = vmul.u32 %v1226_v30, %v3472_v10 }
 0x115   : > { %v520_v41 = vmul.f32 %v519_v16, %v3493_v19  ;;  %v529_v6 = vxor.u32 2147483648, %v512_v4  ;;  %v3581_v19 = vmul.u32 %v1226_v30, %v3475_v17  ;;  %v1210_v39 = vshll.u32 %v1207_v8, 16 }
 0x116   : > { %v1212_v1 = vshll.u32 %v1208_v34, 16  ;;  %v964_v16 = vmul.f32 %v963_v31, %v961_v29  ;;  %v1232_v50 = vshll.u32 %v1229_v33, 16  ;;  %v1190_v21 = vsel %vm1188_vm14, %v3513_v20, 2102212464 }
 0x117   : > { %v526_v61 = vxor.u32 2147483648, %v520_v41  ;;  %v530_v42 = vsel %vm528_vm1, %v529_v6, %v520_v41  ;;  %v1769_v36 = vsel %vm1767_vm2, %v529_v6, %v520_v41  ;;  %vm1214_vm8 = vc.u32 %v1206_v56, %v1210_v39 }
 0x118   : > { %v1215_v12 = vsel %vm1214_vm8, 1, %v3199_v0  ;;  %v965_v7 = vxor.u32 2147483648, %v964_v16  ;;  %v1231_v2 = vmul.u32 %v1227_v47, %v3475_v17  ;;  %v1234_v41 = vshll.u32 %v3581_v19, 16 }
 0x119   : > { %v527_v13 = vsel %vm525_vm3, %v512_v4, %v526_v61  ;;  %v1766_v49 = vsel %vm1764_vm4, %v512_v4, %v526_v61  ;;  %v1216_v4 = vadd.s32 %v1210_v39, %v1206_v56  ;;  %v1217_v9 = vadd.s32 %v1215_v12, %v1209_v45 }
 0x11a   : > { %v531_v27 = vsel %vm524_vm5, %v527_v13, %v530_v42  ;;  %v1770_v25 = vsel %vm1763_vm6, %v1766_v49, %v1769_v36  ;;  %v966_v6 = vsel %vm845_vm9, %v965_v7, %v964_v16  ;;  %vm1236_vm12 = vc.u32 %v1228_v11, %v1232_v50  ;;  %v310_v42 = vpop.permute.xlu1 %309 }
 0x11b   : > { %v532_v53 = vsel %vm521_vm7, nan, %v531_v27  ;;  %v1771_v54 = vsel %vm521_vm7, nan, %v1770_v25  ;;  %vm1218_vm10 = vc.u32 %v1216_v4, %v1212_v1  ;;  %v1238_v61 = vadd.s32 %v1232_v50, %v1228_v11 }
 0x11c   : > { %2850 = vst [vmem:[%s3603_s4] sm:$0xff] %v1771_v54  ;;  %v1219_v55 = vsel %vm1218_vm10, 1, %v3199_v0  ;;  %v969_v10 = vsel %vm3524_vm11, %v3324_v15, %v966_v6  ;;  %v1211_v30 = vshrl.u32 %v1207_v8, 16  ;;  %v1237_v20 = vsel %vm1236_vm12, 1, %v3199_v0 }
 0x11d   : > { %3043 = vst [vmem:[%s3603_s4 + $0x40] sm:$0xff] %v532_v53  ;;  %v1221_v31 = vadd.s32 %v1219_v55, %v1217_v9  ;;  %v971_v56 = vmul.f32 %v969_v10, %v969_v10  ;;  %v1191_v17 = vsel %vm1187_vm0, %v3511_v46, %v1190_v21  ;;  %v1239_v47 = vadd.s32 %v1237_v20, %v1231_v2 }
 0x11e   : > { %vm1240_vm14 = vc.u32 %v1238_v61, %v1234_v41  ;;  %v1213_v36 = vshrl.u32 %v1208_v34, 16  ;;  %v2998_v13 = vadd.s32 4294967169, %v3518_v23  ;;  %v1233_v8 = vshrl.u32 %v1229_v33, 16 }
 0x11f   : > { %v1222_v29 = vadd.s32 %v1221_v31, %v1211_v30  ;;  %v1241_v39 = vsel %vm1240_vm14, 1, %v3199_v0  ;;  %v972_v58 = vmul.f32 -0.001358992, %v971_v56  ;;  %v979_v49 = vmul.f32 -0.00019511016, %v971_v56 }
 0x120   : > { %v1243_v45 = vadd.s32 %v1241_v39, %v1239_v47  ;;  %v987_v1 = vadd.s32 3, %v3567_v18  ;;  %v543_v25 = vadd.s32 1, %v2998_v13  ;;  %v320_v46 = vmul.f32 %v3301_v43, %v310_v42 }
 0x121   : > { %v3626_v27 = vadd.s32 %v1222_v29, %v1213_v36  ;;  %v973_v16 = vadd.f32 0.041655596, %v972_v58  ;;  %v980_v53 = vadd.f32 0.008332121, %v979_v49  ;;  %v1235_v34 = vshrl.u32 %v3581_v19, 16 }
 0x122   : > { %v1244_v54 = vadd.s32 %v1243_v45, %v1233_v8  ;;  %v2224_v12 = vand.u32 3, %v3567_v18  ;;  %v1192_v23 = vsel %vm1186_vm13, %v3572_v51, %v1191_v17  ;;  %v3634_v33 = vadd.s32 %v1238_v61, %v1234_v41 }
 0x123   : > { %vm544_vm9 = vcmp.gt.s32.totalorder %v543_v25, 0  ;;  %v974_v4 = vmul.f32 %v973_v16, %v971_v56  ;;  %v981_v7 = vmul.f32 %v980_v53, %v971_v56  ;;  %v988_v50 = vand.u32 3, %v987_v1 }
 0x124   : > { %v1245_v9 = vadd.s32 %v1244_v54, %v1235_v34  ;;  %v545_v11 = vsel %vm544_vm9, %v543_v25, 0  ;;  %vm1248_vm11 = vc.u32 %v3626_v27, %v3634_v33  ;;  %v3639_v19 = vadd.f32 %v320_v46, %v3313_v59 }
 0x125   : > { %v547_v21 = vand.u32 31, %v545_v11  ;;  %v975_v18 = vadd.f32 -0.4999988, %v974_v4  ;;  %v982_v2 = vadd.f32 -0.16666654, %v981_v7  ;;  %v3643_v60 = vmul.f32 %v3301_v43, %v3421_v14 }
 0x126   : > { %v1249_v6 = vadd.s32 1, %v1245_v9  ;;  %v1246_v51 = vmul.u32 %v3458_v63, %v1192_v23  ;;  %v540_v41 = vand.u32 8388607, %v533_v24  ;;  %vm2225_vm13 = vcmp.lt.s32.totalorder %v2224_v12, 2 }
 0x127   : > { %v3648_v55 = vsub.s32 32, %v547_v21  ;;  %v976_v61 = vmul.f32 %v975_v18, %v971_v56  ;;  %v983_v30 = vmul.f32 %v982_v2, %v971_v56  ;;  %vm2226_vm15 = vcmp.eq.s32.totalorder %v2224_v12, 0 }
 0x128   : > { %v1250_v59 = vsel %vm1248_vm11, %v1249_v6, %v1245_v9  ;;  %vm986_vm0 = vweird.f32 %v3324_v15  ;;  %vm989_vm1 = vcmp.lt.s32.totalorder %v988_v50, 2  ;;  %vm990_vm2 = vcmp.eq.s32.totalorder %v988_v50, 0 }
 0x129   : > { %vm2229_vm3 = vcmp.eq.s32.totalorder %v2224_v12, 2  ;;  %v1251_v31 = vadd.s32 %v1250_v59, %v1246_v51  ;;  %v977_v14 = vadd.f32 1.0, %v976_v61  ;;  %v984_v20 = vadd.f32 1.0, %v983_v30  ;;  %v355_v30 = vpop.permute.xlu0 %354 }
 0x12a   : > { %vm993_vm4 = vcmp.eq.s32.totalorder %v988_v50, 2  ;;  %v551_v63 = vshrl.u32 %v3204_v28, %v3648_v55  ;;  %v541_v47 = vor.u32 8388608, %v540_v41  ;;  %v554_v56 = vshrl.u32 %v3205_v32, %v3648_v55 }
 0x12b   : > { %v1252_v17 = vadd.s32 536870912, %v1251_v31  ;;  %v560_v42 = vshrl.u32 %v3207_v38, %v3648_v55  ;;  %v985_v36 = vmul.f32 %v984_v20, %v969_v10  ;;  %v994_v29 = vxor.u32 2147483648, %v977_v14 }
 0x12c   : > { %v3657_v39 = vshrl.u32 %v545_v11, 5  ;;  %v550_v13 = vshll.u32 %v3203_v26, %v547_v21  ;;  %v553_v49 = vshll.u32 %v3204_v28, %v547_v21  ;;  %v556_v8 = vshll.u32 %v3205_v32, %v547_v21 }
 0x12d   : > { %v3660_v58 = vshrl.u32 %v1252_v17, 30  ;;  %v559_v45 = vshll.u32 %v3206_v35, %v547_v21  ;;  %v991_v1 = vxor.u32 2147483648, %v985_v36  ;;  %v557_v46 = vshrl.u32 %v3206_v35, %v3648_v55 }
 0x12e   : > { %v552_v25 = vor.u32 %v551_v63, %v550_v13  ;;  %v563_v10 = vshrl.u32 %v3208_v44, %v3648_v55  ;;  %v555_v53 = vor.u32 %v554_v56, %v553_v49  ;;  %v562_v54 = vshll.u32 %v3207_v38, %v547_v21 }
 0x12f   : > { %v1254_v16 = vshll.u32 %v3660_v58, 30  ;;  %v561_v34 = vor.u32 %v560_v42, %v559_v45  ;;  %v992_v23 = vsel %vm990_vm2, %v977_v14, %v991_v1  ;;  %v995_v4 = vsel %vm993_vm4, %v994_v29, %v985_v36 }
 0x130   : > { %v2228_v7 = vsel %vm2226_vm15, %v977_v14, %v991_v1  ;;  %v2231_v9 = vsel %vm2229_vm3, %v994_v29, %v985_v36  ;;  %v996_v11 = vsel %vm989_vm1, %v992_v23, %v995_v4  ;;  %v3677_v6 = vshll.u32 %v541_v47, 8 }
 0x131   : > { %v2232_v18 = vsel %vm2225_vm13, %v2228_v7, %v2231_v9  ;;  %v1255_v2 = vsub.s32 %v1251_v31, %v1254_v16  ;;  %v997_v51 = vsel %vm986_vm0, nan, %v996_v11  ;;  %v558_v41 = vor.u32 %v557_v46, %v556_v8 }
 0x132   : > { %v2233_v21 = vsel %vm986_vm0, nan, %v2232_v18  ;;  %v564_v61 = vor.u32 %v563_v10, %v562_v54  ;;  %vm565_vm6 = vcmp.lt.s32.totalorder %v3657_v39, 1  ;;  %vm568_vm7 = vcmp.lt.s32.totalorder %v3657_v39, 4  ;;  %3046 = vst [vmem:[%s3603_s4 + $0x58] sm:$0xff] %v997_v51 }
 0x133   : > { %2853 = vst [vmem:[%s3603_s4 + $0x18] sm:$0xff] %v2233_v21  ;;  %vm1256_vm5 = vcmp.lt.s32.totalorder %v1255_v2, 0  ;;  %v1257_v59 = vsub.s32 0, %v1255_v2  ;;  %v3688_v12 = vmul.f32 %v3301_v43, %v3520_v62  ;;  %v573_v50 = vsel %vm565_vm6, %v552_v25, %v555_v53 }
 0x134   : > { %v574_v15 = vsel %vm568_vm7, %v561_v34, 920167782  ;;  %vm566_vm8 = vcmp.lt.s32.totalorder %v3657_v39, 2  ;;  %vm567_vm10 = vcmp.lt.s32.totalorder %v3657_v39, 3  ;;  %v368_v14 = vmul.f32 %v3311_v57, %v355_v30 }
 0x135   : > { %v1258_v31 = vsel %vm1256_vm5, %v1257_v59, %v1255_v2  ;;  %v575_v63 = vsel %vm567_vm10, %v558_v41, %v574_v15  ;;  %v577_v62 = vsel %vm565_vm6, %v555_v53, %v558_v41  ;;  %v578_v17 = vsel %vm568_vm7, %v564_v61, 1326507024 }
 0x136   : > { %v1259_v20 = vclz %v1258_v31  ;;  %v327_v47 = vadd.f32 %v3643_v60, %v3306_v52  ;;  %v1247_v56 = vadd.s32 %v3634_v33, %v3626_v27  ;;  %v576_v42 = vsel %vm566_vm8, %v573_v50, %v575_v63 }
 0x137   : > { %v582_v36 = vand.u32 65535, %v3677_v6  ;;  %v579_v13 = vsel %vm567_vm10, %v561_v34, %v578_v17  ;;  %v606_v49 = vand.u32 65535, %v576_v42  ;;  %v607_v8 = vshrl.u32 %v576_v42, 16 }
 0x138   : > { %v3011_v29 = vadd.s32 4294967294, %v1259_v20  ;;  %v570_v45 = vsel %vm568_vm7, %v558_v41, 2102212464  ;;  %v580_v52 = vsel %vm566_vm8, %v577_v62, %v579_v13  ;;  %v583_v60 = vshrl.u32 %v3677_v6, 16 }
 0x139   : > { %v3718_v27 = vadd.f32 %v368_v14, %v327_v47  ;;  %v549_v33 = vshrl.u32 %v3203_v26, %v3648_v55  ;;  %v584_v1 = vand.u32 65535, %v580_v52  ;;  %v585_v46 = vshrl.u32 %v580_v52, 16 }
 0x13a   : > { %vm3012_vm12 = vcmp.lt.s32.totalorder %v3011_v29, 0  ;;  %v1277_v16 = vsub.s32 4, %v3660_v58  ;;  %v609_v34 = vmul.u32 %v607_v8, %v582_v36  ;;  %v610_v54 = vmul.u32 %v606_v49, %v583_v60 }
 0x13b   : > { %v1262_v10 = vsel %vm3012_vm12, 0, %v3011_v29  ;;  %v569_v7 = vsel %vm565_vm6, %v549_v33, %v552_v25  ;;  %v571_v9 = vsel %vm567_vm10, %v555_v53, %v570_v45  ;;  %vm1155_vm14 = vcmp.lt.s32.totalorder %v3419_v37, 0 }
 0x13c   : > { %v1263_v23 = vsub.s32 32, %v1262_v10  ;;  %v1267_v4 = vsub.s32 4294967266, %v1262_v10  ;;  %v587_v11 = vmul.u32 %v585_v46, %v582_v36  ;;  %v588_v18 = vmul.u32 %v584_v1, %v583_v60 }
 0x13d   : > { %v608_v55 = vmul.u32 %v606_v49, %v582_v36  ;;  %v612_v51 = vshll.u32 %v609_v34, 16  ;;  %v1264_v21 = vshll.u32 %v1255_v2, %v1262_v10  ;;  %v611_v30 = vmul.u32 %v607_v8, %v583_v60 }
 0x13e   : > { %v1265_v41 = vshrl.u32 %v1247_v56, %v1263_v23  ;;  %v1268_v61 = vadd.s32 127, %v1267_v4  ;;  %v586_v59 = vmul.u32 %v584_v1, %v582_v36  ;;  %v589_v50 = vmul.u32 %v585_v46, %v583_v60  ;;  %v339_v23 = vpop.permute.xlu1 %338 }
 0x13f   : > { %v590_v15 = vshll.u32 %v587_v11, 16  ;;  %v614_v31 = vshll.u32 %v610_v54, 16  ;;  %v592_v25 = vshll.u32 %v588_v18, 16  ;;  %vm616_vm9 = vc.u32 %v608_v55, %v612_v51 }
 0x140   : > { %v1266_v14 = vor.u32 %v1265_v41, %v1264_v21  ;;  %v1269_v20 = vshll.u32 %v1268_v61, 23  ;;  %v617_v63 = vsel %vm616_vm9, 1, %v3199_v0  ;;  %v618_v62 = vadd.s32 %v612_v51, %v608_v55 }
 0x141   : > { %vm594_vm11 = vc.u32 %v586_v59, %v590_v15  ;;  %v596_v53 = vadd.s32 %v590_v15, %v586_v59  ;;  %v619_v2 = vadd.s32 %v617_v63, %v611_v30  ;;  %v1308_v56 = vand.u32 2147483647, %v3718_v27 }
 0x142   : > { %v1270_v17 = vor.u32 4788187, %v1269_v20  ;;  %v595_v47 = vsel %vm594_vm11, 1, %v3199_v0  ;;  %v613_v36 = vshrl.u32 %v609_v34, 16  ;;  %vm620_vm15 = vc.u32 %v618_v62, %v614_v31 }
 0x143   : > { %v597_v42 = vadd.s32 %v595_v47, %v589_v50  ;;  %vm598_vm13 = vc.u32 %v596_v53, %v592_v25  ;;  %v1273_v13 = vcvt.s32.f32 %v1266_v14  ;;  %v621_v8 = vsel %vm620_vm15, 1, %v3199_v0 }
 0x144   : > { %v1271_v29 = vand.u32 2147483647, %v1270_v17  ;;  %v599_v49 = vsel %vm598_vm13, 1, %v3199_v0  ;;  %v591_v45 = vshrl.u32 %v587_v11, 16  ;;  %v623_v60 = vadd.s32 %v621_v8, %v619_v2 }
 0x145   : > { %v601_v52 = vadd.s32 %v599_v49, %v597_v42  ;;  %v1311_v33 = vand.u32 2139095040, %v3718_v27  ;;  %vm3736_vm0 = vcmp.le.f32.partialorder %v1153_v22, 0.7853982  ;;  %v1278_v10 = vsel %vm1155_vm14, %v1277_v16, %v3660_v58 }
 0x146   : > { %v1274_v46 = vmul.f32 %v1273_v13, %v1271_v29  ;;  %v593_v34 = vshrl.u32 %v588_v18, 16  ;;  %v615_v55 = vshrl.u32 %v610_v54, 16  ;;  %v624_v11 = vadd.s32 %v623_v60, %v613_v36 }
 0x147   : > { %v602_v4 = vadd.s32 %v601_v52, %v591_v45  ;;  %v1312_v51 = vshrl.u32 %v1311_v33, 23  ;;  %v572_v41 = vsel %vm566_vm8, %v569_v7, %v571_v9  ;;  %v622_v61 = vadd.s32 %v618_v62, %v614_v31 }
 0x148   : > { %v1275_v21 = vxor.u32 2147483648, %v1274_v46  ;;  %v1315_v22 = vand.u32 8388607, %v1308_v56  ;;  %v625_v59 = vadd.s32 %v624_v11, %v615_v55  ;;  %v364_v15 = vmul.f32 %v3311_v57, %v339_v23 }
 0x149   : > { %v603_v30 = vadd.s32 %v602_v4, %v593_v34  ;;  %v3013_v50 = vadd.s32 4294967169, %v1312_v51  ;;  %v1280_v16 = vsel %vm3736_vm0, 0, %v1278_v10  ;;  %v323_v54 = vadd.f32 %v3688_v12, %v3297_v40 }
 0x14a   : > { %v1276_v58 = vsel %vm1155_vm14, %v1275_v21, %v1274_v46  ;;  %v629_v7 = vadd.s32 1, %v625_v59  ;;  %v626_v18 = vmul.u32 %v3677_v6, %v572_v41  ;;  %v1297_v14 = vadd.s32 3, %v1280_v16 }
 0x14b   : > { %v1279_v39 = vsel %vm3736_vm0, %v3419_v37, %v1276_v58  ;;  %vm628_vm1 = vc.u32 %v603_v30, %v622_v61  ;;  %v1318_v31 = vadd.s32 1, %v3013_v50  ;;  %v1316_v25 = vor.u32 8388608, %v1315_v22 }
 0x14c   : > { %v1281_v9 = vmul.f32 %v1279_v39, %v1279_v39  ;;  %v630_v20 = vsel %vm628_vm1, %v629_v7, %v625_v59  ;;  %v3758_v53 = vadd.f32 %v364_v15, %v323_v54  ;;  %v3760_v2 = vand.u32 3, %v1280_v16 }
 0x14d   : > { %v631_v17 = vadd.s32 %v630_v20, %v626_v18  ;;  %vm1319_vm2 = vcmp.gt.s32.totalorder %v1318_v31, 0  ;;  %v1298_v36 = vand.u32 3, %v1297_v14  ;;  %v3766_v52 = vshll.u32 %v1316_v25, 8 }
 0x14e   : > { %v1282_v63 = vmul.f32 -0.001358992, %v1281_v9  ;;  %v1289_v62 = vmul.f32 -0.00019511016, %v1281_v9  ;;  %v1320_v40 = vsel %vm1319_vm2, %v1318_v31, 0  ;;  %v691_v13 = vand.u32 2139095040, %v3758_v53 }
 0x14f   : > { %v632_v42 = vadd.s32 536870912, %v631_v17  ;;  %v1322_v29 = vand.u32 31, %v1320_v40  ;;  %v688_v6 = vand.u32 2147483647, %v3758_v53  ;;  %vm1300_vm3 = vcmp.eq.s32.totalorder %v1298_v36, 0 }
 0x150   : > { %v1283_v12 = vadd.f32 0.041655596, %v1282_v63  ;;  %v1290_v47 = vadd.f32 0.008332121, %v1289_v62  ;;  %vm1303_vm4 = vcmp.eq.s32.totalorder %v1298_v36, 2  ;;  %vm2534_vm5 = vcmp.eq.s32.totalorder %v3760_v2, 0 }
 0x151   : > { %v3764_v45 = vshrl.u32 %v632_v42, 30  ;;  %v3768_v60 = vsub.s32 32, %v1322_v29  ;;  %vm2537_vm6 = vcmp.eq.s32.totalorder %v3760_v2, 2  ;;  %v3773_v10 = vadd.s32 %v622_v61, %v603_v30 }
 0x152   : > { %v1284_v49 = vmul.f32 %v1283_v12, %v1281_v9  ;;  %v1291_v8 = vmul.f32 %v1290_v47, %v1281_v9  ;;  %v692_v34 = vshrl.u32 %v691_v13, 23  ;;  %v3777_v23 = vand.u32 8388607, %v688_v6 }
 0x153   : > { %v634_v46 = vshll.u32 %v3764_v45, 30  ;;  %vm1299_vm7 = vcmp.lt.s32.totalorder %v1298_v36, 2  ;;  %vm2533_vm8 = vcmp.lt.s32.totalorder %v3760_v2, 2  ;;  %v3783_v51 = vand.u32 65535, %v3766_v52 }
 0x154   : > { %v1285_v33 = vadd.f32 -0.4999988, %v1284_v49  ;;  %v1292_v1 = vadd.f32 -0.16666654, %v1291_v8  ;;  %vm1296_vm10 = vweird.f32 %v3419_v37  ;;  %v1326_v21 = vshrl.u32 %v3204_v28, %v3768_v60 }
 0x155   : > { %v3780_v11 = vsub.s32 %v631_v17, %v634_v46  ;;  %v1329_v41 = vshrl.u32 %v3205_v32, %v3768_v60  ;;  %v1332_v61 = vshrl.u32 %v3206_v35, %v3768_v60  ;;  %v3793_v22 = vshrl.u32 %v3766_v52, 16 }
 0x156   : > { %v1286_v4 = vmul.f32 %v1285_v33, %v1281_v9  ;;  %v1293_v55 = vmul.f32 %v1292_v1, %v1281_v9  ;;  %vm535_vm14 = vcmp.lt.s32.totalorder %v3462_v5, 0  ;;  %v1325_v15 = vshll.u32 %v3203_v26, %v1322_v29 }
 0x157   : > { %vm636_vm12 = vcmp.lt.s32.totalorder %v3780_v11, 0  ;;  %v637_v50 = vsub.s32 0, %v3780_v11  ;;  %v1328_v58 = vshll.u32 %v3204_v28, %v1322_v29  ;;  %v3001_v16 = vadd.s32 4294967169, %v692_v34 }
 0x158   : > { %v1287_v30 = vadd.f32 1.0, %v1286_v4  ;;  %v1294_v59 = vadd.f32 1.0, %v1293_v55  ;;  %v696_v54 = vor.u32 8388608, %v3777_v23  ;;  %v1331_v31 = vshll.u32 %v3205_v32, %v1322_v29 }
 0x159   : > { %v638_v18 = vsel %vm636_vm12, %v637_v50, %v3780_v11  ;;  %v657_v20 = vsub.s32 4, %v3764_v45  ;;  %v3804_v25 = vshrl.u32 %v1320_v40, 5  ;;  %v1335_v63 = vshrl.u32 %v3207_v38, %v3768_v60 }
 0x15a   : > { %v1295_v7 = vmul.f32 %v1294_v59, %v1279_v39  ;;  %v1304_v9 = vxor.u32 2147483648, %v1287_v30  ;;  %v639_v14 = vclz %v638_v18  ;;  %vm3810_vm9 = vcmp.le.f32.partialorder %v533_v24, 0.7853982 }
 0x15b   : > { %v1327_v39 = vor.u32 %v1326_v21, %v1325_v15  ;;  %v1330_v12 = vor.u32 %v1329_v41, %v1328_v58  ;;  %v1333_v47 = vor.u32 %v1332_v61, %v1331_v31  ;;  %v1334_v40 = vshll.u32 %v3206_v35, %v1322_v29 }
 0x15c   : > { %v1301_v62 = vxor.u32 2147483648, %v1295_v7  ;;  %v1305_v42 = vsel %vm1303_vm4, %v1304_v9, %v1295_v7  ;;  %v2999_v13 = vadd.s32 4294967294, %v639_v14  ;;  %v1337_v49 = vshll.u32 %v3207_v38, %v1322_v29 }
 0x15d   : > { %v2539_v24 = vsel %vm2537_vm6, %v1304_v9, %v1295_v7  ;;  %v1338_v1 = vshrl.u32 %v3208_v44, %v3768_v60  ;;  %v1336_v4 = vor.u32 %v1335_v63, %v1334_v40  ;;  %vm1340_vm13 = vcmp.lt.s32.totalorder %v3804_v25, 1 }
 0x15e   : > { %v1302_v8 = vsel %vm1300_vm3, %v1287_v30, %v1301_v62  ;;  %v2536_v33 = vsel %vm2534_vm5, %v1287_v30, %v1301_v62  ;;  %vm3000_vm11 = vcmp.lt.s32.totalorder %v2999_v13, 0  ;;  %v698_v36 = vadd.s32 1, %v3001_v16 }
 0x15f   : > { %v1306_v46 = vsel %vm1299_vm7, %v1302_v8, %v1305_v42  ;;  %v2540_v34 = vsel %vm2533_vm8, %v2536_v33, %v2539_v24  ;;  %v642_v21 = vsel %vm3000_vm11, 0, %v2999_v13  ;;  %v1339_v41 = vor.u32 %v1338_v1, %v1337_v49 }
 0x160   : > { %v1307_v29 = vsel %vm1296_vm10, nan, %v1306_v46  ;;  %v2541_v55 = vsel %vm1296_vm10, nan, %v2540_v34  ;;  %v643_v61 = vsub.s32 32, %v642_v21  ;;  %v647_v30 = vsub.s32 4294967266, %v642_v21 }
 0x161   : > { %2855 = vst [vmem:[%s3603_s4 + $0x28] sm:$0xff] %v2541_v55  ;;  %v644_v2 = vshll.u32 %v3780_v11, %v642_v21  ;;  %v658_v59 = vsel %vm535_vm14, %v657_v20, %v3764_v45  ;;  %vm1343_vm15 = vcmp.lt.s32.totalorder %v3804_v25, 4  ;;  %v1348_v37 = vsel %vm1340_vm13, %v1327_v39, %v1330_v12 }
 0x162   : > { %3048 = vst [vmem:[%s3603_s4 + $0x68] sm:$0xff] %v1307_v29  ;;  %v645_v50 = vshrl.u32 %v3773_v10, %v643_v61  ;;  %v648_v15 = vadd.s32 127, %v647_v30  ;;  %vm1342_vm0 = vcmp.lt.s32.totalorder %v3804_v25, 3  ;;  %v1349_v58 = vsel %vm1343_vm15, %v1336_v4, 920167782 }
 0x163   : > { %vm1341_vm1 = vcmp.lt.s32.totalorder %v3804_v25, 2  ;;  %v1350_v11 = vsel %vm1342_vm0, %v1333_v47, %v1349_v58  ;;  %v1352_v45 = vsel %vm1340_vm13, %v1330_v12, %v1333_v47  ;;  %v1353_v16 = vsel %vm1343_vm15, %v1339_v41, 1326507024 }
 0x164   : > { %v646_v7 = vor.u32 %v645_v50, %v644_v2  ;;  %v649_v9 = vshll.u32 %v648_v15, 23  ;;  %v660_v10 = vsel %vm3810_vm9, 0, %v658_v59  ;;  %v1351_v18 = vsel %vm1341_vm1, %v1348_v37, %v1350_v11 }
 0x165   : > { %v1324_v31 = vshrl.u32 %v3203_v26, %v3768_v60  ;;  %v1354_v14 = vsel %vm1342_vm0, %v1336_v4, %v1353_v16  ;;  %v1381_v20 = vand.u32 65535, %v1351_v18  ;;  %v1382_v63 = vshrl.u32 %v1351_v18, 16 }
 0x166   : > { %v650_v62 = vor.u32 4788187, %v649_v9  ;;  %v1345_v42 = vsel %vm1343_vm15, %v1333_v47, 2102212464  ;;  %v1355_v13 = vsel %vm1341_vm1, %v1352_v45, %v1354_v14  ;;  %vm699_vm2 = vcmp.gt.s32.totalorder %v698_v36, 0 }
 0x167   : > { %v677_v40 = vadd.s32 3, %v660_v10  ;;  %v1359_v49 = vand.u32 65535, %v1355_v13  ;;  %v1360_v8 = vshrl.u32 %v1355_v13, 16  ;;  %v1384_v33 = vmul.u32 %v1382_v63, %v3783_v51 }
 0x168   : > { %v651_v24 = vand.u32 2147483647, %v650_v62  ;;  %v653_v60 = vcvt.s32.f32 %v646_v7  ;;  %v1344_v1 = vsel %vm1340_vm13, %v1324_v31, %v1327_v39  ;;  %v1385_v46 = vmul.u32 %v1381_v20, %v3793_v22 }
 0x169   : > { %v1346_v34 = vsel %vm1342_vm0, %v1330_v12, %v1345_v42  ;;  %v1362_v47 = vmul.u32 %v1360_v8, %v3783_v51  ;;  %v1363_v4 = vmul.u32 %v1359_v49, %v3793_v22  ;;  %v700_v29 = vsel %vm699_vm2, %v698_v36, 0 }
 0x16a   : > { %v654_v55 = vmul.f32 %v653_v60, %v651_v24  ;;  %v1383_v21 = vmul.u32 %v1381_v20, %v3783_v51  ;;  %v1386_v41 = vmul.u32 %v1382_v63, %v3793_v22  ;;  %v1387_v61 = vshll.u32 %v1384_v33, 16 }
 0x16b   : > { %v1361_v30 = vmul.u32 %v1359_v49, %v3783_v51  ;;  %v1364_v39 = vmul.u32 %v1360_v8, %v3793_v22  ;;  %v1365_v2 = vshll.u32 %v1362_v47, 16  ;;  %v1389_v59 = vshll.u32 %v1385_v46, 16 }
 0x16c   : > { %v655_v37 = vxor.u32 2147483648, %v654_v55  ;;  %v1367_v50 = vshll.u32 %v1363_v4, 16  ;;  %vm1391_vm3 = vc.u32 %v1383_v21, %v1387_v61  ;;  %v1393_v12 = vadd.s32 %v1387_v61, %v1383_v21 }
 0x16d   : > { %vm1369_vm4 = vc.u32 %v1361_v30, %v1365_v2  ;;  %v1371_v15 = vadd.s32 %v1365_v2, %v1361_v30  ;;  %v1392_v36 = vsel %vm1391_vm3, 1, %v3199_v0  ;;  %v702_v58 = vand.u32 31, %v700_v29 }
 0x16e   : > { %v656_v11 = vsel %vm535_vm14, %v655_v37, %v654_v55  ;;  %v1370_v45 = vsel %vm1369_vm4, 1, %v3199_v0  ;;  %v1394_v16 = vadd.s32 %v1392_v36, %v1386_v41  ;;  %vm1395_vm5 = vc.u32 %v1393_v12, %v1389_v59 }
 0x16f   : > { %v3883_v51 = vsel %vm3810_vm9, %v3462_v5, %v656_v11  ;;  %v1372_v22 = vadd.s32 %v1370_v45, %v1364_v39  ;;  %vm1373_vm6 = vc.u32 %v1371_v15, %v1367_v50  ;;  %v1396_v7 = vsel %vm1395_vm5, 1, %v3199_v0 }
 0x170   : > { %v661_v9 = vmul.f32 %v3883_v51, %v3883_v51  ;;  %v1374_v18 = vsel %vm1373_vm6, 1, %v3199_v0  ;;  %v1388_v31 = vshrl.u32 %v1384_v33, 16  ;;  %v1398_v14 = vadd.s32 %v1396_v7, %v1394_v16 }
 0x171   : > { %v1347_v20 = vsel %vm1341_vm1, %v1344_v1, %v1346_v34  ;;  %v1366_v63 = vshrl.u32 %v1362_v47, 16  ;;  %v1376_v62 = vadd.s32 %v1374_v18, %v1372_v22  ;;  %v1390_v42 = vshrl.u32 %v1385_v46, 16 }
 0x172   : > { %v662_v17 = vmul.f32 -0.001358992, %v661_v9  ;;  %v669_v13 = vmul.f32 -0.00019511016, %v661_v9  ;;  %v1399_v49 = vadd.s32 %v1398_v14, %v1388_v31  ;;  %v3891_v8 = vsub.s32 32, %v702_v58 }
 0x173   : > { %v3893_v24 = vand.u32 3, %v677_v40  ;;  %v3895_v60 = vand.u32 3, %v660_v10  ;;  %v1368_v55 = vshrl.u32 %v1363_v4, 16  ;;  %v1377_v21 = vadd.s32 %v1376_v62, %v1366_v63 }
 0x174   : > { %v663_v41 = vadd.f32 0.041655596, %v662_v17  ;;  %v670_v33 = vadd.f32 0.008332121, %v669_v13  ;;  %v1400_v61 = vadd.s32 %v1399_v49, %v1390_v42  ;;  %v1401_v25 = vmul.u32 %v3766_v52, %v1347_v20 }
 0x175   : > { %v3898_v1 = vadd.s32 %v1377_v21, %v1368_v55  ;;  %v3900_v34 = vadd.s32 %v1393_v12, %v1389_v59  ;;  %v3902_v46 = vshrl.u32 %v700_v29, 5  ;;  %v708_v47 = vshll.u32 %v3204_v28, %v702_v58 }
 0x176   : > { %v664_v30 = vmul.f32 %v663_v41, %v661_v9  ;;  %v671_v40 = vmul.f32 %v670_v33, %v661_v9  ;;  %v1404_v39 = vadd.s32 1, %v1400_v61  ;;  %v709_v10 = vshrl.u32 %v3205_v32, %v3891_v8 }
 0x177   : > { %vm1403_vm7 = vc.u32 %v3898_v1, %v3900_v34  ;;  %v712_v52 = vshrl.u32 %v3206_v35, %v3891_v8  ;;  %v714_v4 = vshll.u32 %v3206_v35, %v702_v58  ;;  %v715_v29 = vshrl.u32 %v3207_v38, %v3891_v8 }
 0x178   : > { %v665_v2 = vadd.f32 -0.4999988, %v664_v30  ;;  %v672_v59 = vadd.f32 -0.16666654, %v671_v40  ;;  %v1405_v37 = vsel %vm1403_vm7, %v1404_v39, %v1400_v61  ;;  %v718_v50 = vshrl.u32 %v3208_v44, %v3891_v8 }
 0x179   : > { %vm1918_vm8 = vcmp.eq.s32.totalorder %v3895_v60, 0  ;;  %vm1921_vm10 = vcmp.eq.s32.totalorder %v3895_v60, 2  ;;  %v1406_v12 = vadd.s32 %v1405_v37, %v1401_v25  ;;  %v706_v15 = vshrl.u32 %v3204_v28, %v3891_v8 }
 0x17a   : > { %v711_v36 = vshll.u32 %v3205_v32, %v702_v58  ;;  %v717_v11 = vshll.u32 %v3207_v38, %v702_v58  ;;  %v666_v45 = vmul.f32 %v665_v2, %v661_v9  ;;  %v673_v16 = vmul.f32 %v672_v59, %v661_v9 }
 0x17b   : > { %vm1917_vm12 = vcmp.lt.s32.totalorder %v3895_v60, 2  ;;  %v705_v22 = vshll.u32 %v3203_v26, %v702_v58  ;;  %v716_v7 = vor.u32 %v715_v29, %v714_v4  ;;  %vm676_vm14 = vweird.f32 %v3462_v5  ;;  %v347_v5 = vpop.permute.xlu1 %346 }
 0x17c   : > { %v1407_v18 = vadd.s32 536870912, %v1406_v12  ;;  %v3925_v31 = vor.u32 %v709_v10, %v708_v47  ;;  %v3927_v14 = vor.u32 %v712_v52, %v711_v36  ;;  %v719_v20 = vor.u32 %v718_v50, %v717_v11 }
 0x17d   : > { %v667_v63 = vadd.f32 1.0, %v666_v45  ;;  %v674_v62 = vadd.f32 1.0, %v673_v16  ;;  %vm679_vm9 = vcmp.lt.s32.totalorder %v3893_v24, 2  ;;  %vm680_vm11 = vcmp.eq.s32.totalorder %v3893_v24, 0 }
 0x17e   : > { %vm683_vm13 = vcmp.eq.s32.totalorder %v3893_v24, 2  ;;  %v3932_v9 = vshrl.u32 %v1407_v18, 30  ;;  %v3934_v58 = vor.u32 %v706_v15, %v705_v22  ;;  %vm723_vm15 = vcmp.lt.s32.totalorder %v3902_v46, 4 }
 0x17f   : > { %v675_v42 = vmul.f32 %v674_v62, %v3883_v51  ;;  %v684_v17 = vxor.u32 2147483648, %v667_v63  ;;  %vm720_vm0 = vcmp.lt.s32.totalorder %v3902_v46, 1  ;;  %v729_v13 = vsel %vm723_vm15, %v716_v7, 920167782 }
 0x180   : > { %v1409_v49 = vshll.u32 %v3932_v9, 30  ;;  %vm722_vm1 = vcmp.lt.s32.totalorder %v3902_v46, 3  ;;  %v732_v55 = vsel %vm720_vm0, %v3925_v31, %v3927_v14  ;;  %v733_v21 = vsel %vm723_vm15, %v719_v20, 1326507024 }
 0x181   : > { %v681_v41 = vxor.u32 2147483648, %v675_v42  ;;  %vm721_vm2 = vcmp.lt.s32.totalorder %v3902_v46, 2  ;;  %v734_v51 = vsel %vm722_vm1, %v716_v7, %v733_v21  ;;  %v3954_v33 = vshll.u32 %v696_v54, 8 }
 0x182   : > { %v685_v61 = vsel %vm683_vm13, %v684_v17, %v675_v42  ;;  %v1410_v25 = vsub.s32 %v1406_v12, %v1409_v49  ;;  %v728_v47 = vsel %vm720_vm0, %v3934_v58, %v3925_v31  ;;  %v730_v30 = vsel %vm722_vm1, %v3927_v14, %v729_v13 }
 0x183   : > { %v682_v40 = vsel %vm680_vm11, %v667_v63, %v681_v41  ;;  %v1920_v23 = vsel %vm1918_vm8, %v667_v63, %v681_v41  ;;  %v1923_v54 = vsel %vm1921_vm10, %v684_v17, %v675_v42  ;;  %v735_v39 = vsel %vm721_vm2, %v732_v55, %v734_v51 }
 0x184   : > { %v686_v10 = vsel %vm679_vm9, %v682_v40, %v685_v61  ;;  %v1924_v52 = vsel %vm1917_vm12, %v1920_v23, %v1923_v54  ;;  %vm1411_vm3 = vcmp.lt.s32.totalorder %v1410_v25, 0  ;;  %v1412_v4 = vsub.s32 0, %v1410_v25 }
 0x185   : > { %v317_v29 = vmul.f32 %v3301_v43, %v3576_v3  ;;  %v687_v2 = vsel %vm676_vm14, nan, %v686_v10  ;;  %v1925_v59 = vsel %vm676_vm14, nan, %v1924_v52  ;;  %v737_v37 = vand.u32 65535, %v3954_v33 }
 0x186   : > { %2851 = vst [vmem:[%s3603_s4 + $0x8] sm:$0xff] %v1925_v59  ;;  %v1413_v50 = vsel %vm1411_vm3, %v1412_v4, %v1410_v25  ;;  %v738_v24 = vshrl.u32 %v3954_v33, 16  ;;  %v739_v12 = vand.u32 65535, %v735_v39  ;;  %v740_v60 = vshrl.u32 %v735_v39, 16 }
 0x187   : > { %3044 = vst [vmem:[%s3603_s4 + $0x48] sm:$0xff] %v687_v2  ;;  %v1414_v15 = vclz %v1413_v50  ;;  %v731_v36 = vsel %vm721_vm2, %v728_v47, %v730_v30  ;;  %v325_v11 = vadd.f32 %v317_v29, %v3303_v48  ;;  %v704_v16 = vshrl.u32 %v3203_v26, %v3891_v8 }
 0x188   : > { %v742_v43 = vmul.u32 %v740_v60, %v737_v37  ;;  %v743_v3 = vmul.u32 %v739_v12, %v738_v24  ;;  %v741_v22 = vmul.u32 %v739_v12, %v737_v37  ;;  %v761_v18 = vand.u32 65535, %v731_v36 }
 0x189   : > { %v3014_v45 = vadd.s32 4294967294, %v1414_v15  ;;  %v1402_v20 = vadd.s32 %v3900_v34, %v3898_v1  ;;  %v744_v63 = vmul.u32 %v740_v60, %v738_v24  ;;  %v762_v62 = vshrl.u32 %v731_v36, 16  ;;  %v359_v60 = vpop.permute.xlu1 %358 }
 0x18a   : > { %v745_v7 = vshll.u32 %v742_v43, 16  ;;  %v747_v17 = vshll.u32 %v743_v3, 16  ;;  %vm1310_vm6 = vcmp.lt.s32.totalorder %v3718_v27, 0  ;;  %v725_v8 = vsel %vm723_vm15, %v3927_v14, 2102212464 }
 0x18b   : > { %vm3015_vm4 = vcmp.lt.s32.totalorder %v3014_v45, 0  ;;  %v764_v1 = vmul.u32 %v762_v62, %v737_v37  ;;  %v765_v34 = vmul.u32 %v761_v18, %v738_v24  ;;  %v1432_v30 = vsub.s32 4, %v3932_v9 }
 0x18c   : > { %v1417_v42 = vsel %vm3015_vm4, 0, %v3014_v45  ;;  %vm749_vm5 = vc.u32 %v741_v22, %v745_v7  ;;  %v751_v13 = vadd.s32 %v745_v7, %v741_v22  ;;  %v763_v23 = vmul.u32 %v761_v18, %v737_v37 }
 0x18d   : > { %v1418_v48 = vsub.s32 32, %v1417_v42  ;;  %v1422_v49 = vsub.s32 4294967266, %v1417_v42  ;;  %v750_v55 = vsel %vm749_vm5, 1, %v3199_v0  ;;  %v1419_v41 = vshll.u32 %v1410_v25, %v1417_v42 }
 0x18e   : > { %v752_v21 = vadd.s32 %v750_v55, %v744_v63  ;;  %vm753_vm7 = vc.u32 %v751_v13, %v747_v17  ;;  %v767_v54 = vshll.u32 %v764_v1, 16  ;;  %v746_v52 = vshrl.u32 %v742_v43, 16 }
 0x18f   : > { %v1420_v51 = vshrl.u32 %v1402_v20, %v1418_v48  ;;  %v1423_v61 = vadd.s32 127, %v1422_v49  ;;  %v754_v47 = vsel %vm753_vm7, 1, %v3199_v0  ;;  %v766_v14 = vmul.u32 %v762_v62, %v738_v24 }
 0x190   : > { %v756_v40 = vadd.s32 %v754_v47, %v752_v21  ;;  %v769_v4 = vshll.u32 %v765_v34, 16  ;;  %vm771_vm8 = vc.u32 %v763_v23, %v767_v54  ;;  %v773_v29 = vadd.s32 %v767_v54, %v763_v23 }
 0x191   : > { %v1421_v39 = vor.u32 %v1420_v51, %v1419_v41  ;;  %v1424_v10 = vshll.u32 %v1423_v61, 23  ;;  %v366_v2 = vmul.f32 %v3311_v57, %v347_v5  ;;  %v724_v25 = vsel %vm720_vm0, %v704_v16, %v3934_v58 }
 0x192   : > { %v757_v50 = vadd.s32 %v756_v40, %v746_v52  ;;  %v772_v12 = vsel %vm771_vm8, 1, %v3199_v0  ;;  %v726_v37 = vsel %vm722_vm1, %v3925_v31, %v725_v8  ;;  %v748_v15 = vshrl.u32 %v743_v3, 16 }
 0x193   : > { %v1425_v59 = vor.u32 4788187, %v1424_v10  ;;  %v774_v24 = vadd.s32 %v772_v12, %v766_v14  ;;  %vm775_vm10 = vc.u32 %v773_v29, %v769_v4  ;;  %v1428_v43 = vcvt.s32.f32 %v1421_v39 }
 0x194   : > { %v776_v45 = vsel %vm775_vm10, 1, %v3199_v0  ;;  %v4010_v5 = vadd.f32 %v366_v2, %v325_v11  ;;  %v1433_v58 = vsel %vm1310_vm6, %v1432_v30, %v3932_v9  ;;  %v768_v16 = vshrl.u32 %v764_v1, 16 }
 0x195   : > { %v1426_v36 = vand.u32 2147483647, %v1425_v59  ;;  %v778_v22 = vadd.s32 %v776_v45, %v774_v24  ;;  %v369_v7 = vmul.f32 %v3311_v57, %v359_v60  ;;  %v758_v20 = vadd.s32 %v757_v50, %v748_v15 }
 0x196   : > { %v998_v31 = vand.u32 2147483647, %v4010_v5  ;;  %v1001_v3 = vand.u32 2139095040, %v4010_v5  ;;  %vm1309_vm12 = vcmp.le.f32.partialorder %v1308_v56, 0.7853982  ;;  %v770_v63 = vshrl.u32 %v765_v34, 16 }
 0x197   : > { %v1429_v18 = vmul.f32 %v1428_v43, %v1426_v36  ;;  %v779_v11 = vadd.s32 %v778_v22, %v768_v16  ;;  %v727_v42 = vsel %vm721_vm2, %v724_v25, %v726_v37  ;;  %v777_v9 = vadd.s32 %v773_v29, %v769_v4 }
 0x198   : > { %v1002_v17 = vshrl.u32 %v1001_v3, 23  ;;  %v1435_v13 = vsel %vm1309_vm12, 0, %v1433_v58  ;;  %v1005_v57 = vand.u32 8388607, %v998_v31  ;;  %v4025_v49 = vadd.f32 %v369_v7, %v3639_v19 }
 0x199   : > { %v1430_v62 = vxor.u32 2147483648, %v1429_v18  ;;  %v780_v48 = vadd.s32 %v779_v11, %v770_v63  ;;  %vm783_vm14 = vc.u32 %v758_v20, %v777_v9  ;;  %v1452_v1 = vadd.s32 3, %v1435_v13 }
 0x19a   : > { %v3007_v56 = vadd.s32 4294967169, %v1002_v17  ;;  %v781_v34 = vmul.u32 %v3954_v33, %v727_v42  ;;  %v1006_v61 = vor.u32 8388608, %v1005_v57  ;;  %v1463_v47 = vand.u32 2147483647, %v4025_v49 }
 0x19b   : > { %v1431_v8 = vsel %vm1310_vm6, %v1430_v62, %v1429_v18  ;;  %v784_v21 = vadd.s32 1, %v780_v48  ;;  %v1466_v19 = vand.u32 2139095040, %v4025_v49  ;;  %v4033_v52 = vand.u32 3, %v1435_v13 }
 0x19c   : > { %v1434_v55 = vsel %vm1309_vm12, %v3718_v27, %v1431_v8  ;;  %v1008_v41 = vadd.s32 1, %v3007_v56  ;;  %v4035_v4 = vand.u32 3, %v1452_v1  ;;  %v4039_v2 = vand.u32 8388607, %v1463_v47 }
 0x19d   : > { %v1436_v46 = vmul.f32 %v1434_v55, %v1434_v55  ;;  %v785_v51 = vsel %vm783_vm14, %v784_v21, %v780_v48  ;;  %v1467_v29 = vshrl.u32 %v1466_v19, 23  ;;  %v4041_v12 = vshll.u32 %v1006_v61, 8 }
 0x19e   : > { %v786_v23 = vadd.s32 %v785_v51, %v781_v34  ;;  %vm1009_vm9 = vcmp.gt.s32.totalorder %v1008_v41, 0  ;;  %vm690_vm11 = vcmp.lt.s32.totalorder %v3758_v53, 0  ;;  %vm1455_vm13 = vcmp.eq.s32.totalorder %v4035_v4, 0 }
 0x19f   : > { %v1437_v30 = vmul.f32 -0.001358992, %v1436_v46  ;;  %v1444_v40 = vmul.f32 -0.00019511016, %v1436_v46  ;;  %v1010_v54 = vsel %vm1009_vm9, %v1008_v41, 0  ;;  %vm1458_vm15 = vcmp.eq.s32.totalorder %v4035_v4, 2 }
 0x1a0   : > { %v787_v14 = vadd.s32 536870912, %v786_v23  ;;  %v1012_v33 = vand.u32 31, %v1010_v54  ;;  %vm2688_vm0 = vcmp.eq.s32.totalorder %v4033_v52, 0  ;;  %vm2691_vm1 = vcmp.eq.s32.totalorder %v4033_v52, 2 }
 0x1a1   : > { %v1438_v39 = vadd.f32 0.041655596, %v1437_v30  ;;  %v1445_v10 = vadd.f32 0.008332121, %v1444_v40  ;;  %v4050_v36 = vadd.s32 %v777_v9, %v758_v20  ;;  %v3016_v43 = vadd.s32 4294967169, %v1467_v29 }
 0x1a2   : > { %v788_v50 = vshrl.u32 %v787_v14, 30  ;;  %v4043_v60 = vsub.s32 32, %v1012_v33  ;;  %v1471_v45 = vor.u32 8388608, %v4039_v2  ;;  %vm1454_vm2 = vcmp.lt.s32.totalorder %v4035_v4, 2 }
 0x1a3   : > { %v1439_v59 = vmul.f32 %v1438_v39, %v1436_v46  ;;  %v1446_v25 = vmul.f32 %v1445_v10, %v1436_v46  ;;  %vm2687_vm3 = vcmp.lt.s32.totalorder %v4033_v52, 2  ;;  %v4058_v7 = vand.u32 65535, %v4041_v12 }
 0x1a4   : > { %v789_v24 = vshll.u32 %v788_v50, 30  ;;  %vm1451_vm4 = vweird.f32 %v3718_v27  ;;  %v812_v18 = vsub.s32 4, %v788_v50  ;;  %v1016_v20 = vshrl.u32 %v3204_v28, %v4043_v60 }
 0x1a5   : > { %v1440_v37 = vadd.f32 -0.4999988, %v1439_v59  ;;  %v1447_v15 = vadd.f32 -0.16666654, %v1446_v25  ;;  %v1019_v3 = vshrl.u32 %v3205_v32, %v4043_v60  ;;  %v1022_v63 = vshrl.u32 %v3206_v35, %v4043_v60 }
 0x1a6   : > { %v4055_v22 = vsub.s32 %v786_v23, %v789_v24  ;;  %vm4069_vm5 = vcmp.le.f32.partialorder %v688_v6, 0.7853982  ;;  %v1015_v17 = vshll.u32 %v3203_v26, %v1012_v33  ;;  %v1018_v13 = vshll.u32 %v3204_v28, %v1012_v33 }
 0x1a7   : > { %v1441_v58 = vmul.f32 %v1440_v37, %v1436_v46  ;;  %v1448_v16 = vmul.f32 %v1447_v15, %v1436_v46  ;;  %v4078_v48 = vshrl.u32 %v4041_v12, 16  ;;  %v4080_v57 = vadd.s32 1, %v3016_v43 }
 0x1a8   : > { %vm791_vm6 = vcmp.lt.s32.totalorder %v4055_v22, 0  ;;  %v792_v9 = vsub.s32 0, %v4055_v22  ;;  %v1021_v21 = vshll.u32 %v3205_v32, %v1012_v33  ;;  %v813_v1 = vsel %vm690_vm11, %v812_v18, %v788_v50 }
 0x1a9   : > { %v1442_v11 = vadd.f32 1.0, %v1441_v58  ;;  %v1449_v62 = vadd.f32 1.0, %v1448_v16  ;;  %v4086_v34 = vshrl.u32 %v1010_v54, 5  ;;  %v1025_v41 = vshrl.u32 %v3207_v38, %v4043_v60 }
 0x1aa   : > { %v793_v6 = vsel %vm791_vm6, %v792_v9, %v4055_v22  ;;  %v1017_v61 = vor.u32 %v1016_v20, %v1015_v17  ;;  %v1020_v19 = vor.u32 %v1019_v3, %v1018_v13  ;;  %v1023_v30 = vor.u32 %v1022_v63, %v1021_v21 }
 0x1ab   : > { %v1450_v8 = vmul.f32 %v1449_v62, %v1434_v55  ;;  %v1459_v56 = vxor.u32 2147483648, %v1442_v11  ;;  %v794_v46 = vclz %v793_v6  ;;  %v1024_v23 = vshll.u32 %v3206_v35, %v1012_v33 }
 0x1ac   : > { %v1027_v39 = vshll.u32 %v3207_v38, %v1012_v33  ;;  %vm1474_vm7 = vcmp.gt.s32.totalorder %v4080_v57, 0  ;;  %v1028_v29 = vshrl.u32 %v3208_v44, %v4043_v60  ;;  %v815_v4 = vsel %vm4069_vm5, 0, %v813_v1 }
 0x1ad   : > { %v1456_v51 = vxor.u32 2147483648, %v1450_v8  ;;  %v1460_v55 = vsel %vm1458_vm15, %v1459_v56, %v1450_v8  ;;  %v3002_v40 = vadd.s32 4294967294, %v794_v46  ;;  %v2693_v14 = vsel %vm2691_vm1, %v1459_v56, %v1450_v8 }
 0x1ae   : > { %v1026_v25 = vor.u32 %v1025_v41, %v1024_v23  ;;  %v1029_v24 = vor.u32 %v1028_v29, %v1027_v39  ;;  %vm1030_vm10 = vcmp.lt.s32.totalorder %v4086_v34, 1  ;;  %vm1031_vm12 = vcmp.lt.s32.totalorder %v4086_v34, 2 }
 0x1af   : > { %v1457_v54 = vsel %vm1455_vm13, %v1442_v11, %v1456_v51  ;;  %v2690_v10 = vsel %vm2688_vm0, %v1442_v11, %v1456_v51  ;;  %vm3003_vm8 = vcmp.lt.s32.totalorder %v3002_v40, 0  ;;  %vm1033_vm14 = vcmp.lt.s32.totalorder %v4086_v34, 4 }
 0x1b0   : > { %v1461_v59 = vsel %vm1454_vm2, %v1457_v54, %v1460_v55  ;;  %v2694_v33 = vsel %vm2687_vm3, %v2690_v10, %v2693_v14  ;;  %v797_v15 = vsel %vm3003_vm8, 0, %v3002_v40  ;;  %v1038_v27 = vsel %vm1030_vm10, %v1017_v61, %v1020_v19 }
 0x1b1   : > { %v1462_v50 = vsel %vm1451_vm4, nan, %v1461_v59  ;;  %v2695_v37 = vsel %vm1451_vm4, nan, %v2694_v33  ;;  %v798_v43 = vsub.s32 32, %v797_v15  ;;  %v802_v58 = vsub.s32 4294967266, %v797_v15 }
 0x1b2   : > { %2856 = vst [vmem:[%s3603_s4 + $0x30] sm:$0xff] %v2695_v37  ;;  %v799_v52 = vshll.u32 %v4055_v22, %v797_v15  ;;  %vm1032_vm9 = vcmp.lt.s32.totalorder %v4086_v34, 3  ;;  %v1039_v20 = vsel %vm1033_vm14, %v1026_v25, 920167782  ;;  %v1035_v3 = vsel %vm1033_vm14, %v1023_v30, 2102212464 }
 0x1b3   : > { %3049 = vst [vmem:[%s3603_s4 + $0x70] sm:$0xff] %v1462_v50  ;;  %v800_v16 = vshrl.u32 %v4050_v36, %v798_v43  ;;  %v803_v18 = vadd.s32 127, %v802_v58  ;;  %v1040_v63 = vsel %vm1032_vm9, %v1023_v30, %v1039_v20  ;;  %v1042_v22 = vsel %vm1030_vm10, %v1020_v19, %v1023_v30 }
 0x1b4   : > { %v1043_v11 = vsel %vm1033_vm14, %v1029_v24, 1326507024  ;;  %v1014_v17 = vshrl.u32 %v3203_v26, %v4043_v60  ;;  %v1041_v36 = vsel %vm1031_vm12, %v1038_v27, %v1040_v63  ;;  %v832_v13 = vadd.s32 3, %v815_v4 }
 0x1b5   : > { %v801_v62 = vor.u32 %v800_v16, %v799_v52  ;;  %v804_v9 = vshll.u32 %v803_v18, 23  ;;  %v1044_v8 = vsel %vm1032_vm9, %v1026_v25, %v1043_v11  ;;  %v1071_v56 = vand.u32 65535, %v1041_v36 }
 0x1b6   : > { %v1072_v6 = vshrl.u32 %v1041_v36, 16  ;;  %v1034_v46 = vsel %vm1030_vm10, %v1014_v17, %v1017_v61  ;;  %v1036_v1 = vsel %vm1032_vm9, %v1020_v19, %v1035_v3  ;;  %v1045_v41 = vsel %vm1031_vm12, %v1042_v22, %v1044_v8 }
 0x1b7   : > { %v805_v21 = vor.u32 4788187, %v804_v9  ;;  %v1049_v60 = vand.u32 65535, %v1045_v41  ;;  %v1050_v51 = vshrl.u32 %v1045_v41, 16  ;;  %v1475_v55 = vsel %vm1474_vm7, %v4080_v57, 0 }
 0x1b8   : > { %v1074_v30 = vmul.u32 %v1072_v6, %v4058_v7  ;;  %v808_v23 = vcvt.s32.f32 %v801_v62  ;;  %v4143_v39 = vand.u32 3, %v815_v4  ;;  %v1075_v61 = vmul.u32 %v1071_v56, %v4078_v48 }
 0x1b9   : > { %v806_v40 = vand.u32 2147483647, %v805_v21  ;;  %v4148_v19 = vsel %vm1031_vm12, %v1034_v46, %v1036_v1  ;;  %v1052_v54 = vmul.u32 %v1050_v51, %v4058_v7  ;;  %v1053_v10 = vmul.u32 %v1049_v60, %v4078_v48 }
 0x1ba   : > { %v1073_v14 = vmul.u32 %v1071_v56, %v4058_v7  ;;  %v1076_v59 = vmul.u32 %v1072_v6, %v4078_v48  ;;  %v1077_v57 = vshll.u32 %v1074_v30, 16  ;;  %v1477_v33 = vand.u32 31, %v1475_v55 }
 0x1bb   : > { %v809_v29 = vmul.f32 %v808_v23, %v806_v40  ;;  %v1051_v25 = vmul.u32 %v1049_v60, %v4058_v7  ;;  %v1054_v50 = vmul.u32 %v1050_v51, %v4078_v48  ;;  %v1055_v37 = vshll.u32 %v1052_v54, 16 }
 0x1bc   : > { %v1078_v15 = vshrl.u32 %v1074_v30, 16  ;;  %v1079_v24 = vshll.u32 %v1075_v61, 16  ;;  %vm1081_vm13 = vc.u32 %v1073_v14, %v1077_v57  ;;  %v1083_v43 = vadd.s32 %v1077_v57, %v1073_v14 }
 0x1bd   : > { %v810_v34 = vxor.u32 2147483648, %v809_v29  ;;  %v1057_v58 = vshll.u32 %v1053_v10, 16  ;;  %vm1059_vm15 = vc.u32 %v1051_v25, %v1055_v37  ;;  %v1061_v4 = vadd.s32 %v1055_v37, %v1051_v25 }
 0x1be   : > { %v1082_v52 = vsel %vm1081_vm13, 1, %v3199_v0  ;;  %v1060_v16 = vsel %vm1059_vm15, 1, %v3199_v0  ;;  %vm1085_vm0 = vc.u32 %v1083_v43, %v1079_v24  ;;  %v4169_v11 = vsub.s32 32, %v1477_v33 }
 0x1bf   : > { %v811_v27 = vsel %vm690_vm11, %v810_v34, %v809_v29  ;;  %v1084_v18 = vadd.s32 %v1082_v52, %v1076_v59  ;;  %v1062_v48 = vadd.s32 %v1060_v16, %v1054_v50  ;;  %vm1063_vm1 = vc.u32 %v1061_v4, %v1057_v58 }
 0x1c0   : > { %v4163_v7 = vsel %vm4069_vm5, %v3758_v53, %v811_v27  ;;  %v1086_v20 = vsel %vm1085_vm0, 1, %v3199_v0  ;;  %v1064_v63 = vsel %vm1063_vm1, 1, %v3199_v0  ;;  %v4171_v62 = vand.u32 3, %v832_v13 }
 0x1c1   : > { %v816_v3 = vmul.f32 %v4163_v7, %v4163_v7  ;;  %v1088_v22 = vadd.s32 %v1086_v20, %v1084_v18  ;;  %v1056_v9 = vshrl.u32 %v1052_v54, 16  ;;  %v1066_v17 = vadd.s32 %v1064_v63, %v1062_v48 }
 0x1c2   : > { %v1091_v42 = vmul.u32 %v4041_v12, %v4148_v19  ;;  %v1080_v56 = vshrl.u32 %v1075_v61, 16  ;;  %v1058_v21 = vshrl.u32 %v1053_v10, 16  ;;  %v4175_v1 = vadd.s32 %v1083_v43, %v1079_v24 }
 0x1c3   : > { %v817_v36 = vmul.f32 -0.001358992, %v816_v3  ;;  %v824_v8 = vmul.f32 -0.00019511016, %v816_v3  ;;  %v1089_v6 = vadd.s32 %v1088_v22, %v1078_v15  ;;  %v1067_v46 = vadd.s32 %v1066_v17, %v1056_v9 }
 0x1c4   : > { %v4177_v41 = vshrl.u32 %v1475_v55, 5  ;;  %v1481_v13 = vshrl.u32 %v3204_v28, %v4169_v11  ;;  %v1483_v12 = vshll.u32 %v3204_v28, %v1477_v33  ;;  %v1484_v23 = vshrl.u32 %v3205_v32, %v4169_v11 }
 0x1c5   : > { %v818_v60 = vadd.f32 0.041655596, %v817_v36  ;;  %v825_v51 = vadd.f32 0.008332121, %v824_v8  ;;  %v1090_v30 = vadd.s32 %v1089_v6, %v1080_v56  ;;  %v4181_v40 = vadd.s32 %v1067_v46, %v1058_v21 }
 0x1c6   : > { %v1487_v61 = vshrl.u32 %v3206_v35, %v4169_v11  ;;  %v1490_v10 = vshrl.u32 %v3207_v38, %v4169_v11  ;;  %v1486_v14 = vshll.u32 %v3205_v32, %v1477_v33  ;;  %v1489_v29 = vshll.u32 %v3206_v35, %v1477_v33 }
 0x1c7   : > { %v819_v19 = vmul.f32 %v818_v60, %v816_v3  ;;  %v826_v54 = vmul.f32 %v825_v51, %v816_v3  ;;  %v1094_v55 = vadd.s32 1, %v1090_v30  ;;  %vm1093_vm11 = vc.u32 %v4181_v40, %v4175_v1 }
 0x1c8   : > { %v1492_v28 = vshll.u32 %v3207_v38, %v1477_v33  ;;  %v1493_v50 = vshrl.u32 %v3208_v44, %v4169_v11  ;;  %v1480_v15 = vshll.u32 %v3203_v26, %v1477_v33  ;;  %v4198_v34 = vor.u32 %v1484_v23, %v1483_v12 }
 0x1c9   : > { %v820_v59 = vadd.f32 -0.4999988, %v819_v19  ;;  %v827_v57 = vadd.f32 -0.16666654, %v826_v54  ;;  %v1095_v25 = vsel %vm1093_vm11, %v1094_v55, %v1090_v30  ;;  %v4200_v24 = vor.u32 %v1487_v61, %v1486_v14 }
 0x1ca   : > { %v1096_v37 = vadd.s32 %v1095_v25, %v1091_v42  ;;  %vm2071_vm2 = vcmp.lt.s32.totalorder %v4143_v39, 2  ;;  %v1491_v32 = vor.u32 %v1490_v10, %v1489_v29  ;;  %v1494_v35 = vor.u32 %v1493_v50, %v1492_v28 }
 0x1cb   : > { %v821_v43 = vmul.f32 %v820_v59, %v816_v3  ;;  %v828_v58 = vmul.f32 %v827_v57, %v816_v3  ;;  %vm831_vm3 = vweird.f32 %v3758_v53  ;;  %vm834_vm4 = vcmp.lt.s32.totalorder %v4171_v62, 2 }
 0x1cc   : > { %vm2072_vm5 = vcmp.eq.s32.totalorder %v4143_v39, 0  ;;  %vm2075_vm6 = vcmp.eq.s32.totalorder %v4143_v39, 2  ;;  %v1097_v38 = vadd.s32 536870912, %v1096_v37  ;;  %v4207_v4 = vor.u32 %v1481_v13, %v1480_v15 }
 0x1cd   : > { %v822_v44 = vadd.f32 1.0, %v821_v43  ;;  %v829_v33 = vadd.f32 1.0, %v828_v58  ;;  %vm1495_vm7 = vcmp.lt.s32.totalorder %v4177_v41, 1  ;;  %vm1497_vm8 = vcmp.lt.s32.totalorder %v4177_v41, 3 }
 0x1ce   : > { %v4210_v52 = vshrl.u32 %v1097_v38, 30  ;;  %vm1498_vm10 = vcmp.lt.s32.totalorder %v4177_v41, 4  ;;  %v1507_v27 = vsel %vm1495_vm7, %v4198_v34, %v4200_v24  ;;  %vm835_vm12 = vcmp.eq.s32.totalorder %v4171_v62, 0 }
 0x1cf   : > { %v830_v16 = vmul.f32 %v829_v33, %v4163_v7  ;;  %v839_v18 = vxor.u32 2147483648, %v822_v44  ;;  %v1504_v48 = vsel %vm1498_vm10, %v1491_v32, 920167782  ;;  %v1508_v20 = vsel %vm1498_vm10, %v1494_v35, 1326507024 }
 0x1d0   : > { %v1099_v3 = vshll.u32 %v4210_v52, 30  ;;  %vm1496_vm14 = vcmp.lt.s32.totalorder %v4177_v41, 2  ;;  %v1509_v63 = vsel %vm1497_vm8, %v1491_v32, %v1508_v20  ;;  %vm838_vm9 = vcmp.eq.s32.totalorder %v4171_v62, 2 }
 0x1d1   : > { %v836_v22 = vxor.u32 2147483648, %v830_v16  ;;  %v1503_v7 = vsel %vm1495_vm7, %v4207_v4, %v4198_v34  ;;  %v1510_v9 = vsel %vm1496_vm14, %v1507_v27, %v1509_v63  ;;  %v840_v17 = vsel %vm838_vm9, %v839_v18, %v830_v16 }
 0x1d2   : > { %v1100_v42 = vsub.s32 %v1096_v37, %v1099_v3  ;;  %v1505_v36 = vsel %vm1497_vm8, %v4200_v24, %v1504_v48  ;;  %v4240_v8 = vshll.u32 %v1471_v45, 8  ;;  %v2077_v21 = vsel %vm2075_vm6, %v839_v18, %v830_v16 }
 0x1d3   : > { %v837_v56 = vsel %vm835_vm12, %v822_v44, %v836_v22  ;;  %v2074_v6 = vsel %vm2072_vm5, %v822_v44, %v836_v22  ;;  %v1514_v46 = vand.u32 65535, %v1510_v9  ;;  %v1515_v61 = vshrl.u32 %v1510_v9, 16 }
 0x1d4   : > { %v841_v60 = vsel %vm834_vm4, %v837_v56, %v840_v17  ;;  %v2078_v51 = vsel %vm2071_vm2, %v2074_v6, %v2077_v21  ;;  %vm1101_vm13 = vcmp.lt.s32.totalorder %v1100_v42, 0  ;;  %v1102_v30 = vsub.s32 0, %v1100_v42 }
 0x1d5   : > { %v842_v2 = vsel %vm831_vm3, nan, %v841_v60  ;;  %v2079_v45 = vsel %vm831_vm3, nan, %v2078_v51  ;;  %v1512_v12 = vand.u32 65535, %v4240_v8  ;;  %v1513_v23 = vshrl.u32 %v4240_v8, 16 }
 0x1d6   : > { %2852 = vst [vmem:[%s3603_s4 + $0x10] sm:$0xff] %v2079_v45  ;;  %v1103_v13 = vsel %vm1101_vm13, %v1102_v30, %v1100_v42  ;;  %v1506_v39 = vsel %vm1496_vm14, %v1503_v7, %v1505_v36  ;;  %v1092_v50 = vadd.s32 %v4175_v1, %v4181_v40  ;;  %v1500_v36 = vsel %vm1498_vm10, %v4200_v24, 2102212464 }
 0x1d7   : > { %3045 = vst [vmem:[%s3603_s4 + $0x50] sm:$0xff] %v842_v2  ;;  %v1104_v62 = vclz %v1103_v13  ;;  %v1517_v19 = vmul.u32 %v1515_v61, %v1512_v12  ;;  %v1518_v54 = vmul.u32 %v1514_v46, %v1513_v23  ;;  %v1516_v10 = vmul.u32 %v1514_v46, %v1512_v12 }
 0x1d8   : > { %v1536_v29 = vand.u32 65535, %v1506_v39  ;;  %v1519_v53 = vmul.u32 %v1515_v61, %v1513_v23  ;;  %v1537_v28 = vshrl.u32 %v1506_v39, 16  ;;  %vm1000_vm3 = vcmp.lt.s32.totalorder %v4010_v5, 0 }
 0x1d9   : > { %v3008_v55 = vadd.s32 4294967294, %v1104_v62  ;;  %v1520_v14 = vshll.u32 %v1517_v19, 16  ;;  %v1522_v57 = vshll.u32 %v1518_v54, 16  ;;  %v1521_v63 = vshrl.u32 %v1517_v19, 16 }
 0x1da   : > { %v1539_v32 = vmul.u32 %v1537_v28, %v1512_v12  ;;  %v1540_v35 = vmul.u32 %v1536_v29, %v1513_v23  ;;  %v1538_v18 = vmul.u32 %v1536_v29, %v1512_v12  ;;  %v1541_v1 = vmul.u32 %v1537_v28, %v1513_v23 }
 0x1db   : > { %vm3009_vm15 = vcmp.lt.s32.totalorder %v3008_v55, 0  ;;  %vm1524_vm0 = vc.u32 %v1516_v10, %v1520_v14  ;;  %v1526_v25 = vadd.s32 %v1520_v14, %v1516_v10  ;;  %v1523_v46 = vshrl.u32 %v1518_v54, 16 }
 0x1dc   : > { %v1107_v59 = vsel %vm3009_vm15, 0, %v3008_v55  ;;  %v1525_v43 = vsel %vm1524_vm0, 1, %v3199_v0  ;;  %v1542_v48 = vshll.u32 %v1539_v32, 16  ;;  %v1544_v40 = vshll.u32 %v1540_v35, 16 }
 0x1dd   : > { %v1108_v37 = vsub.s32 32, %v1107_v59  ;;  %v1112_v15 = vsub.s32 4294967266, %v1107_v59  ;;  %v1527_v58 = vadd.s32 %v1525_v43, %v1519_v53  ;;  %vm1528_vm1 = vc.u32 %v1526_v25, %v1522_v57 }
 0x1de   : > { %v1109_v38 = vshll.u32 %v1100_v42, %v1107_v59  ;;  %v1529_v27 = vsel %vm1528_vm1, 1, %v3199_v0  ;;  %vm1546_vm11 = vc.u32 %v1538_v18, %v1542_v48  ;;  %v1548_v22 = vadd.s32 %v1542_v48, %v1538_v18 }
 0x1df   : > { %v1110_v44 = vshrl.u32 %v1092_v50, %v1108_v37  ;;  %v1113_v33 = vadd.s32 127, %v1112_v15  ;;  %v1531_v16 = vadd.s32 %v1529_v27, %v1527_v58  ;;  %v1547_v17 = vsel %vm1546_vm11, 1, %v3199_v0 }
 0x1e0   : > { %v1479_v42 = vshrl.u32 %v3203_v26, %v4169_v11  ;;  %v1549_v56 = vadd.s32 %v1547_v17, %v1541_v1  ;;  %vm1550_vm2 = vc.u32 %v1548_v22, %v1544_v40  ;;  %v1543_v51 = vshrl.u32 %v1539_v32, 16 }
 0x1e1   : > { %v1111_v20 = vor.u32 %v1110_v44, %v1109_v38  ;;  %v1114_v3 = vshll.u32 %v1113_v33, 23  ;;  %v1532_v9 = vadd.s32 %v1531_v16, %v1521_v63  ;;  %v1551_v60 = vsel %vm1550_vm2, 1, %v3199_v0 }
 0x1e2   : > { %v1553_v30 = vadd.s32 %v1551_v60, %v1549_v56  ;;  %v1499_v45 = vsel %vm1495_vm7, %v1479_v42, %v4207_v4  ;;  %v1501_v26 = vsel %vm1497_vm8, %v4198_v34, %v1500_v36  ;;  %v1545_v24 = vshrl.u32 %v1540_v35, 16 }
 0x1e3   : > { %v1115_v7 = vor.u32 4788187, %v1114_v3  ;;  %v1118_v21 = vcvt.s32.f32 %v1111_v20  ;;  %v4277_v11 = vadd.s32 %v1532_v9, %v1523_v46  ;;  %v1552_v23 = vadd.s32 %v1548_v22, %v1544_v40 }
 0x1e4   : > { %v1554_v13 = vadd.s32 %v1553_v30, %v1543_v51  ;;  %v1502_v0 = vsel %vm1496_vm14, %v1499_v45, %v1501_v26  ;;  %vm4284_vm4 = vcmp.le.f32.partialorder %v998_v31, 0.7853982  ;;  %v1122_v34 = vsub.s32 4, %v4210_v52 }
 0x1e5   : > { %v1116_v6 = vand.u32 2147483647, %v1115_v7  ;;  %vm1558_vm5 = vc.u32 %v4277_v11, %v1552_v23  ;;  %v1556_v41 = vmul.u32 %v4240_v8, %v1502_v0  ;;  %vm1141_vm13 = vweird.f32 %v4010_v5 }
 0x1e6   : > { %v1555_v61 = vadd.s32 %v1554_v13, %v1545_v24  ;;  %v1123_v29 = vsel %vm1000_vm3, %v1122_v34, %v4210_v52  ;;  %vm1465_vm0 = vcmp.lt.s32.totalorder %v4025_v49, 0  ;;  %vm1464_vm1 = vcmp.le.f32.partialorder %v1463_v47, 0.7853982 }
 0x1e7   : > { %v1119_v2 = vmul.f32 %v1118_v21, %v1116_v6  ;;  %v1125_v57 = vsel %vm4284_vm4, 0, %v1123_v29  ;;  %v1557_v21 = vadd.s32 %v1552_v23, %v4277_v11 }
 0x1e8   : > { %v1559_v19 = vadd.s32 1, %v1555_v61  ;;  %v1142_v32 = vadd.s32 3, %v1125_v57  ;;  %v2378_v44 = vand.u32 3, %v1125_v57 }
 0x1e9   : > { %v1120_v12 = vxor.u32 2147483648, %v1119_v2 }
 0x1ea   : > { %v1560_v55 = vsel %vm1558_vm5, %v1559_v19, %v1555_v61  ;;  %v1143_v16 = vand.u32 3, %v1142_v32  ;;  %vm2379_vm7 = vcmp.lt.s32.totalorder %v2378_v44, 2  ;;  %vm2380_vm8 = vcmp.eq.s32.totalorder %v2378_v44, 0 }
 0x1eb   : > { %v1121_v62 = vsel %vm1000_vm3, %v1120_v12, %v1119_v2  ;;  %v1561_v31 = vadd.s32 %v1560_v55, %v1556_v41  ;;  %vm2383_vm10 = vcmp.eq.s32.totalorder %v2378_v44, 2 }
 0x1ec   : > { %v1124_v39 = vsel %vm4284_vm4, %v4010_v5, %v1121_v62  ;;  %vm1144_vm12 = vcmp.lt.s32.totalorder %v1143_v16, 2  ;;  %vm1145_vm14 = vcmp.eq.s32.totalorder %v1143_v16, 0  ;;  %vm1148_vm9 = vcmp.eq.s32.totalorder %v1143_v16, 2 }
 0x1ed   : > { %v1126_v54 = vmul.f32 %v1124_v39, %v1124_v39  ;;  %v1562_v59 = vadd.s32 536870912, %v1561_v31 }
 0x1ef   : > { %v1127_v10 = vmul.f32 -0.001358992, %v1126_v54  ;;  %v1134_v14 = vmul.f32 -0.00019511016, %v1126_v54  ;;  %v1563_v37 = vshrl.u32 %v1562_v59, 30 }
 0x1f1   : > { %v1128_v53 = vadd.f32 0.041655596, %v1127_v10  ;;  %v1135_v28 = vadd.f32 0.008332121, %v1134_v14  ;;  %v1564_v58 = vshll.u32 %v1563_v37, 30  ;;  %v1587_v11 = vsub.s32 4, %v1563_v37 }
 0x1f3   : > { %v1129_v25 = vmul.f32 %v1128_v53, %v1126_v54  ;;  %v1136_v50 = vmul.f32 %v1135_v28, %v1126_v54  ;;  %v1565_v38 = vsub.s32 %v1561_v31, %v1564_v58 }
 0x1f5   : > { %v1130_v15 = vadd.f32 -0.4999988, %v1129_v25  ;;  %v1137_v43 = vadd.f32 -0.16666654, %v1136_v50  ;;  %vm1566_vm6 = vcmp.lt.s32.totalorder %v1565_v38, 0  ;;  %v1567_v52 = vsub.s32 0, %v1565_v38 }
 0x1f7   : > { %v1131_v8 = vmul.f32 %v1130_v15, %v1126_v54  ;;  %v1138_v35 = vmul.f32 %v1137_v43, %v1126_v54  ;;  %v1568_v20 = vsel %vm1566_vm6, %v1567_v52, %v1565_v38 }
 0x1f8   : > { %v1569_v3 = vclz %v1568_v20 }
 0x1f9   : > { %v1132_v33 = vadd.f32 1.0, %v1131_v8  ;;  %v1139_v27 = vadd.f32 1.0, %v1138_v35 }
 0x1fa   : > { %v3017_v1 = vadd.s32 4294967294, %v1569_v3 }
 0x1fb   : > { %v1140_v18 = vmul.f32 %v1139_v27, %v1124_v39  ;;  %v1149_v48 = vxor.u32 2147483648, %v1132_v33  ;;  %v1588_v39 = vsel %vm1465_vm0, %v1587_v11, %v1563_v37 }
 0x1fc   : > { %vm3018_vm15 = vcmp.lt.s32.totalorder %v3017_v1, 0  ;;  %v1590_v41 = vsel %vm1464_vm1, 0, %v1588_v39 }
 0x1fd   : > { %v1146_v63 = vxor.u32 2147483648, %v1140_v18  ;;  %v1150_v22 = vsel %vm1148_vm9, %v1149_v48, %v1140_v18  ;;  %v2385_v9 = vsel %vm2383_vm10, %v1149_v48, %v1140_v18  ;;  %v1572_v6 = vsel %vm3018_vm15, 0, %v3017_v1 }
 0x1fe   : > { %v1573_v46 = vsub.s32 32, %v1572_v6  ;;  %v1577_v60 = vsub.s32 4294967266, %v1572_v6  ;;  %v1574_v51 = vshll.u32 %v1565_v38, %v1572_v6  ;;  %v1607_v29 = vadd.s32 3, %v1590_v41 }
 0x1ff   : > { %v1147_v40 = vsel %vm1145_vm14, %v1132_v33, %v1146_v63  ;;  %v2382_v7 = vsel %vm2380_vm8, %v1132_v33, %v1146_v63  ;;  %v2840_v57 = vand.u32 3, %v1590_v41 }
 0x200   : > { %v1151_v17 = vsel %vm1144_vm12, %v1147_v40, %v1150_v22  ;;  %v2386_v42 = vsel %vm2379_vm7, %v2382_v7, %v2385_v9  ;;  %v1575_v30 = vshrl.u32 %v1557_v21, %v1573_v46  ;;  %v1578_v2 = vadd.s32 127, %v1577_v60 }
 0x201   : > { %v1152_v36 = vsel %vm1141_vm13, nan, %v1151_v17  ;;  %v2387_v56 = vsel %vm1141_vm13, nan, %v2386_v42  ;;  %v1608_v25 = vand.u32 3, %v1607_v29  ;;  %vm2841_vm11 = vcmp.lt.s32.totalorder %v2840_v57, 2 }
 0x202   : > { %2854 = vst [vmem:[%s3603_s4 + $0x20] sm:$0xff] %v2387_v56  ;;  %v1576_v45 = vor.u32 %v1575_v30, %v1574_v51  ;;  %v1579_v26 = vshll.u32 %v1578_v2, 23  ;;  %vm2842_vm2 = vcmp.eq.s32.totalorder %v2840_v57, 0  ;;  %vm2845_vm6 = vcmp.eq.s32.totalorder %v2840_v57, 2 }
 0x203   : > { %3047 = vst [vmem:[%s3603_s4 + $0x60] sm:$0xff] %v1152_v36  ;;  %vm1609_vm3 = vcmp.lt.s32.totalorder %v1608_v25, 2  ;;  %vm1610_vm4 = vcmp.eq.s32.totalorder %v1608_v25, 0  ;;  %vm1613_vm5 = vcmp.eq.s32.totalorder %v1608_v25, 2  ;;  %vm1606_vm7 = vweird.f32 %v4025_v49 }
 0x204   : > { %v1580_v24 = vor.u32 4788187, %v1579_v26  ;;  %v1583_v5 = vcvt.s32.f32 %v1576_v45 }
 0x206   : > { %v1581_v13 = vand.u32 2147483647, %v1580_v24 }
 0x208   : > { %v1584_v12 = vmul.f32 %v1583_v5, %v1581_v13 }
 0x20a   : > { %v1585_v0 = vxor.u32 2147483648, %v1584_v12 }
 0x20c   : > { %v1586_v61 = vsel %vm1465_vm0, %v1585_v0, %v1584_v12 }
 0x20d   : > { %v1589_v23 = vsel %vm1464_vm1, %v4025_v49, %v1586_v61 }
 0x20e   : > { %v1591_v4 = vmul.f32 %v1589_v23, %v1589_v23 }
 0x210   : > { %v1592_v62 = vmul.f32 -0.001358992, %v1591_v4  ;;  %v1599_v34 = vmul.f32 -0.00019511016, %v1591_v4 }
 0x212   : > { %v1593_v19 = vadd.f32 0.041655596, %v1592_v62  ;;  %v1600_v54 = vadd.f32 0.008332121, %v1599_v34 }
 0x214   : > { %v1594_v55 = vmul.f32 %v1593_v19, %v1591_v4  ;;  %v1601_v10 = vmul.f32 %v1600_v54, %v1591_v4 }
 0x216   : > { %v1595_v14 = vadd.f32 -0.4999988, %v1594_v55  ;;  %v1602_v31 = vadd.f32 -0.16666654, %v1601_v10 }
 0x218   : > { %v1596_v53 = vmul.f32 %v1595_v14, %v1591_v4  ;;  %v1603_v28 = vmul.f32 %v1602_v31, %v1591_v4 }
 0x21a   : > { %v1597_v59 = vadd.f32 1.0, %v1596_v53  ;;  %v1604_v47 = vadd.f32 1.0, %v1603_v28 }
 0x21c   : > { %v1605_v50 = vmul.f32 %v1604_v47, %v1589_v23  ;;  %v1614_v15 = vxor.u32 2147483648, %v1597_v59 }
 0x21e   : > { %v1611_v43 = vxor.u32 2147483648, %v1605_v50  ;;  %v1615_v58 = vsel %vm1613_vm5, %v1614_v15, %v1605_v50  ;;  %v2847_v8 = vsel %vm2845_vm6, %v1614_v15, %v1605_v50 }
 0x220   : > { %v1612_v37 = vsel %vm1610_vm4, %v1597_v59, %v1611_v43  ;;  %v2844_v32 = vsel %vm2842_vm2, %v1597_v59, %v1611_v43 }
 0x221   : > { %v1616_v35 = vsel %vm1609_vm3, %v1612_v37, %v1615_v58  ;;  %v2848_v38 = vsel %vm2841_vm11, %v2844_v32, %v2847_v8 }
 0x222   : > { %v1617_v44 = vsel %vm1606_vm7, nan, %v1616_v35  ;;  %v2849_v33 = vsel %vm1606_vm7, nan, %v2848_v38 }
 0x223   : > { %2857 = vst [vmem:[%s3603_s4 + $0x38] sm:$0xff] %v2849_v33 }
 0x224   : > { %3050 = vst [vmem:[%s3603_s4 + $0x78] sm:$0xff] %v1617_v44 }
 0x225   : > { %s3057_s6 = sshll.u32 %s3189_s12, 6  ;;  %s2892_s7 = sshll.u32 %s3603_s4, 4  ;;  %s2893_s7 = int_to_ptr.vmem [resolvable:$true] %s2892_s7 }
 0x226   : > { %s2881_s16 = scalar_lea.hbm %s4353_s2, %s3057_s6  ;;  %s3209_s20 = smov 1024  }
 0x227   : > { %s2894_s18 = sshll.u32 %s2881_s16, 4  ;;  %3058 = sst [smem:[#allocation5]] (%p3270_p4), %s3209_s20  ;;  %s2895_s18 = int_to_ptr.hbm [resolvable:$true] %s2894_s18 }
 0x228   : > { %s3210_s23 = smov 2048   ;;  %s3211_s24 = smov 8  }
 0x229   : > { %3059 = sst [smem:[#allocation5 + $0x1]] (%p3270_p4), %s3210_s23  ;;  %s3212_s25 = smov 128  }
 0x22a   : > { %3060 = sst [smem:[#allocation5 + $0x2]] (%p3270_p4), %s3211_s24  ;;  %s3213_s12 = smov [#allocation4]  }
 0x22b   : > { %3061 = sst [smem:[#allocation5 + $0x3]] (%p3270_p4), %s3212_s25  ;;  %s3214_s26 = smov 0  }
 0x22c   : > { %3062 = sst [smem:[#allocation5 + $0x4]] (%p3270_p4), %s3212_s25 }
 0x22d   : > { %3063 = sst [smem:[#allocation5 + $0x5]] (%p3270_p4), %s3211_s24 }
 0x22e   : > { %3064 = dma.general (%p3270_p4), %s2893_s7, 2048, %s2895_s18, %s2868_s5, %s3213_s12, [#allocation5], %s3214_s26, 0  }
 0x22f PF: > { %p3070_p12 = scmp.ge.s32.totalorder %s3197_s14, 2  ;;  %s2922_s27 = sand.u32 1, %s3177_s9  }
 0x230   : > { %s2923_s28 = scalar_lea.sflag [#allocation3], %s2922_s27 }
 0x231   : > { %p3067_p13 = pnand %p3070_p12, %p3277_p8 }
 0x233   : > { %p3068_p0 = pneg %p3067_p13 }
 0x235   : > { %3172 = dma.done.wait (%p3068_p0), %s2923_s28, 2048  }
 0x236   : > { %3174 = vsyncadd (%p3068_p0), %s2923_s28, 4294965248  ;;  %s15_s14 = sadd.s32 1, %s3197_s14   ;;  %s4368_s9 = smov %s3181_s10 }
 0x237   : > { %p12_p1 = scmp.ge.s32.totalorder %s15_s14, 4   ;;  %s4369_s10 = smov %s3185_s11 }
 0x238   : > { %s4370_s11 = smov %s3283_s22  ;;  %s4371_s12 = smov %s3193_s13 }
 0x239   : > { %s4372_s13 = smov %s4374_s17  ;;  %14 = sbr.rel (!%p12_p1) target bundleno = 4 (0x4), region = 69 }
 0x23e   :  { %2929 = vsyncpa [#allocation3], 1 }
 0x23f   :  { %2931 = vsyncpa [#allocation3 + $0x1], 1 }

</bundles_post_ra>
